<compile_context>
chip_gen: v7x
topology: tpu7x:2x2x1
jax: 0.10.0
libtpu: 0.0.40
codegen_flags: <defaults>
</compile_context>

<pallas_src>
import functools

import jax
import jax.numpy as jnp
from jax import lax
from jax.experimental import pallas as pl
from jax.experimental.pallas import tpu as pltpu  # noqa: F401  (TPU backend)


# --------------------------------------------------------------------------
# Fused kernel: cell-MLP + [emb|act] head + relation + softmax*act + routing
# bmm.  Single program, flattened M = B * n_wrd_cells rows for the MXU.
# --------------------------------------------------------------------------
def _strn_fused_kernel(wcode_ref, vs_emb_ref, view_cell_ref,
                       fc1_w_ref, fc1_b_ref, fc2_w_ref, fc2_b_ref,
                       head_w_ref, head_b_ref,
                       out_ref, *, emb_size, n_wrd_cells, batch,
                       compute_dtype):
    cdt = compute_dtype
    f32 = jnp.float32

    # ---- Cell MLP on the flattened (M, wcode) rows (MXU-friendly M) ------
    h = jnp.dot(wcode_ref[...], fc1_w_ref[...], preferred_element_type=f32)
    h = jnp.maximum(h + fc1_b_ref[...], 0.0)                      # (M, 256)
    h = jnp.dot(h.astype(cdt), fc2_w_ref[...], preferred_element_type=f32)
    h = jnp.maximum(h + fc2_b_ref[...], 0.0)                      # (M, 256)

    # ---- Fused [fc_emb | fc_act] head: one matmul instead of two ---------
    head = jnp.dot(h.astype(cdt), head_w_ref[...],
                   preferred_element_type=f32) + head_b_ref[...]  # (M, emb+1)
    cs_emb = head[:, :emb_size]                                   # (M, emb)
    activation = jax.nn.sigmoid(head[:, emb_size:emb_size + 1])   # (M, 1)

    # ---- relation = cs_emb @ vs_emb^T (trans-B contraction, no transpose)
    relation = lax.dot_general(
        cs_emb.astype(cdt), vs_emb_ref[...],
        dimension_numbers=(((1,), (1,)), ((), ())),
        preferred_element_type=f32)                               # (M, n_view)

    # ---- softmax over view cells * activation -----------------------------
    m = jnp.max(relation, axis=-1, keepdims=True)
    e = jnp.exp(relation - m)
    inv = pl.reciprocal(jnp.sum(e, axis=-1, keepdims=True), approx=False)
    # Reassociated: fold the two (M,1) columns first, one (M,256) multiply.
    route = (e * (inv * activation)).astype(cdt)                  # (M, n_view)

    # ---- Routing bmm fused in: static per-batch loop (B is small) ---------
    # out[b, n, c] = sum_v route[b*n_wrd + n, v] * view_cell[b, c, v]
    for b in range(batch):
        r_b = route[b * n_wrd_cells:(b + 1) * n_wrd_cells]        # (n_wrd, V)
        out_ref[b] = lax.dot_general(
            r_b, view_cell_ref[b],
            dimension_numbers=(((1,), (1,)), ((), ())),
            preferred_element_type=f32)                           # (n_wrd, csize)


# --------------------------------------------------------------------------
# Parameter init (deterministic, PyTorch-Linear-like uniform fan-in init)
# --------------------------------------------------------------------------
def init_params(key, vsize, wcode_size, emb_size, n_wrd_cells):
    def linear(k, fan_in, fan_out):
        kw, kb = jax.random.split(k)
        lim = 1.0 / (fan_in ** 0.5)
        w = jax.random.uniform(kw, (fan_in, fan_out), jnp.float32, -lim, lim)
        b = jax.random.uniform(kb, (1, fan_out), jnp.float32, -lim, lim)
        return w, b

    keys = jax.random.split(key, 8)
    p = {}
    p['w2c_w1'], p['w2c_b1'] = linear(keys[0], vsize, 512)
    p['w2c_w2'], p['w2c_b2'] = linear(keys[1], 512, wcode_size * n_wrd_cells)
    p['fc1_w'], p['fc1_b'] = linear(keys[2], wcode_size, 256)
    p['fc2_w'], p['fc2_b'] = linear(keys[3], 256, 256)
    p['fca_w'], p['fca_b'] = linear(keys[4], 256, 1)
    p['fce_w'], p['fce_b'] = linear(keys[5], 256, emb_size)
    p['vse_w1'], p['vse_b1'] = linear(keys[6], 2, 128)
    p['vse_w2'], p['vse_b2'] = linear(keys[7], 128, emb_size)
    return p


# --------------------------------------------------------------------------
# Forward wrapper
# --------------------------------------------------------------------------
def strn_forward(view_cell, v, params, *, view_size, n_wrd_cells,
                 wcode_size, emb_size, compute_dtype=jnp.bfloat16):
    B = v.shape[0]
    H, W = view_size
    csize = view_cell.shape[1]
    M = B * n_wrd_cells
    cdt = compute_dtype

    # w2c MLP is tiny (~0.3 MFLOP): plain XLA, no kernel launch; the
    # (B, wcode*n_wrd) -> (B*n_wrd, wcode) reshape is free here.
    h0 = jnp.maximum(v @ params['w2c_w1'] + params['w2c_b1'], 0.0)
    wcode = (h0 @ params['w2c_w2'] + params['w2c_b2']).reshape(M, wcode_size)

    # View-cell coordinate code (torch.meshgrid 'ij' + cat + permute), and the
    # batch-invariant vse MLP, both hoisted to the wrapper (K=2 matmul is a
    # wasted MXU pass in-kernel; the replacement input is only 32 KB).
    xs = jnp.linspace(-1.0, 1.0, H, dtype=jnp.float32)
    ys = jnp.linspace(-1.0, 1.0, W, dtype=jnp.float32)
    xg, yg = jnp.meshgrid(xs, ys, indexing='ij')
    vcode = jnp.stack([xg.reshape(-1), yg.reshape(-1)], axis=1)    # (n_view, 2)
    vs = jnp.maximum(vcode @ params['vse_w1'] + params['vse_b1'], 0.0)
    vs_emb = vs @ params['vse_w2'] + params['vse_b2']              # (n_view, emb)

    # Fuse fc_emb and fc_act into one (256, emb+1) weight (wrapper-side, free).
    head_w = jnp.concatenate([params['fce_w'], params['fca_w']], axis=1)
    head_b = jnp.concatenate([params['fce_b'], params['fca_b']], axis=1)

    # Single fused kernel.  Pre-cast MXU operands to compute_dtype in the
    # wrapper so no weight-side casts happen in-kernel; biases stay f32 and
    # are added to the f32 accumulators.
    out_nc = pl.pallas_call(
        functools.partial(_strn_fused_kernel, emb_size=emb_size,
                          n_wrd_cells=n_wrd_cells, batch=B,
                          compute_dtype=cdt),
        out_shape=jax.ShapeDtypeStruct((B, n_wrd_cells, csize), jnp.float32),
    )(wcode.astype(cdt), vs_emb.astype(cdt), view_cell.astype(cdt),
      params['fc1_w'].astype(cdt), params['fc1_b'],
      params['fc2_w'].astype(cdt), params['fc2_b'],
      head_w.astype(cdt), head_b)

    # Kernel emits the lane-dense (B, n_wrd, csize=128) layout; transpose to
    # the PyTorch (B, csize, n_wrd) output.  Downstream consumers that accept
    # (B, n_wrd, csize) can skip this.
    return out_nc.transpose(0, 2, 1)


# --------------------------------------------------------------------------
# Pure-JAX reference (semantics of the PyTorch forward) for verification
# --------------------------------------------------------------------------
def strn_ref(view_cell, v, params, *, view_size, n_wrd_cells,
             wcode_size, emb_size):
    B = v.shape[0]
    H, W = view_size
    h0 = jnp.maximum(v @ params['w2c_w1'] + params['w2c_b1'], 0.0)
    wcode = (h0 @ params['w2c_w2'] + params['w2c_b2']).reshape(B * n_wrd_cells,
                                                               wcode_size)
    h1 = jnp.maximum(wcode @ params['fc1_w'] + params['fc1_b'], 0.0)
    h2 = jnp.maximum(h1 @ params['fc2_w'] + params['fc2_b'], 0.0)
    act = jax.nn.sigmoid(h2 @ params['fca_w'] + params['fca_b']
                         ).reshape(B, n_wrd_cells, 1)
    cs = (h2 @ params['fce_w'] + params['fce_b']).reshape(B, n_wrd_cells, emb_size)
    xs = jnp.linspace(-1.0, 1.0, H, dtype=jnp.float32)
    ys = jnp.linspace(-1.0, 1.0, W, dtype=jnp.float32)
    xg, yg = jnp.meshgrid(xs, ys, indexing='ij')
    vcode = jnp.stack([xg.reshape(-1), yg.reshape(-1)], axis=1)
    vs = jnp.maximum(vcode @ params['vse_w1'] + params['vse_b1'], 0.0)
    vs = vs @ params['vse_w2'] + params['vse_b2']
    relation = jnp.einsum('bnc,vc->bnv', cs, vs)
    dist = jax.nn.softmax(relation, axis=2)
    route = dist * act
    return jnp.einsum('bcv,bnv->bcn', view_cell, route)


if __name__ == "__main__":
    # Small, module-consistent shapes (view_size matches the module default,
    # which also makes n_view_cells = 256 lane-dense).
    B, vsize, wcode_size, emb_size, csize = 2, 7, 4, 32, 128
    n_wrd_cells = 64
    view_size = (16, 16)
    n_view_cells = view_size[0] * view_size[1]

    key = jax.random.PRNGKey(0)
    kp, kv, kvc = jax.random.split(key, 3)
    params = init_params(kp, vsize, wcode_size, emb_size, n_wrd_cells)
    v = jax.random.normal(kv, (B, vsize), dtype=jnp.float32)
    view_cell = jax.random.normal(kvc, (B, csize, n_view_cells), dtype=jnp.float32)

    ref = strn_ref(view_cell, v, params, view_size=view_size,
                   n_wrd_cells=n_wrd_cells, wcode_size=wcode_size,
                   emb_size=emb_size)

    # Default path: bf16 MXU operands, f32 accumulate.
    out_bf16 = strn_forward(view_cell, v, params, view_size=view_size,
                            n_wrd_cells=n_wrd_cells, wcode_size=wcode_size,
                            emb_size=emb_size)
    out_bf16 = jax.block_until_ready(out_bf16)
    assert out_bf16.shape == (B, csize, n_wrd_cells), out_bf16.shape
    assert jnp.allclose(out_bf16, ref, atol=1e-2, rtol=1e-2), \
        float(jnp.max(jnp.abs(out_bf16 - ref)))

    # f32 path for a tighter correctness check.
    out_f32 = strn_forward(view_cell, v, params, view_size=view_size,
                           n_wrd_cells=n_wrd_cells, wcode_size=wcode_size,
                           emb_size=emb_size, compute_dtype=jnp.float32)
    out_f32 = jax.block_until_ready(out_f32)
    assert jnp.allclose(out_f32, ref, atol=2e-3, rtol=2e-3), \
        float(jnp.max(jnp.abs(out_f32 - ref)))

    print("KERNEL_OK")
</pallas_src>

<mosaic_0001>
module attributes {stable_mosaic.version = 11 : i64} {
  func.func @_strn_fused_kernel(%arg0: memref<128x4xbf16, #tpu.memory_space<vmem>>, %arg1: memref<256x32xbf16, #tpu.memory_space<vmem>>, %arg2: memref<2x128x256xbf16, #tpu.memory_space<vmem>>, %arg3: memref<4x256xbf16, #tpu.memory_space<vmem>>, %arg4: memref<1x256xf32, #tpu.memory_space<vmem>>, %arg5: memref<256x256xbf16, #tpu.memory_space<vmem>>, %arg6: memref<1x256xf32, #tpu.memory_space<vmem>>, %arg7: memref<256x33xbf16, #tpu.memory_space<vmem>>, %arg8: memref<1x33xf32, #tpu.memory_space<vmem>>, %arg9: memref<2x64x128xf32, #tpu.memory_space<vmem>>) attributes {dimension_semantics = [], scalar_prefetch = 0 : i64, scratch_operands = 0 : i64, tpu.core_type = #tpu.core_type<tc>} {
    %c0 = arith.constant 0 : index
    %c0_0 = arith.constant 0 : index
    %0 = vector.load %arg0[%c0, %c0_0] : memref<128x4xbf16, #tpu.memory_space<vmem>>, vector<128x4xbf16>
    %c0_1 = arith.constant 0 : index
    %c0_2 = arith.constant 0 : index
    %1 = vector.load %arg3[%c0_1, %c0_2] : memref<4x256xbf16, #tpu.memory_space<vmem>>, vector<4x256xbf16>
    %cst = arith.constant dense<0.000000e+00> : vector<128x256xf32>
    %2 = tpu.matmul %0, %1, %cst {dimension_numbers = #tpu.dot_dimension_numbers<[1], [0], [0], [1], [0, 0, 1, 1], [], []>} : vector<128x4xbf16>, vector<4x256xbf16>, vector<128x256xf32> -> vector<128x256xf32>
    %c0_3 = arith.constant 0 : index
    %c0_4 = arith.constant 0 : index
    %3 = vector.load %arg4[%c0_3, %c0_4] : memref<1x256xf32, #tpu.memory_space<vmem>>, vector<1x256xf32>
    %4 = vector.broadcast %3 : vector<1x256xf32> to vector<128x256xf32>
    %5 = arith.addf %2, %4 : vector<128x256xf32>
    %cst_5 = arith.constant 0.000000e+00 : f32
    %6 = vector.broadcast %cst_5 : f32 to vector<128x256xf32>
    %7 = arith.maximumf %5, %6 : vector<128x256xf32>
    %8 = arith.truncf %7 : vector<128x256xf32> to vector<128x256xbf16>
    %c0_6 = arith.constant 0 : index
    %c0_7 = arith.constant 0 : index
    %9 = vector.load %arg5[%c0_6, %c0_7] : memref<256x256xbf16, #tpu.memory_space<vmem>>, vector<256x256xbf16>
    %cst_8 = arith.constant dense<0.000000e+00> : vector<128x256xf32>
    %10 = tpu.matmul %8, %9, %cst_8 {dimension_numbers = #tpu.dot_dimension_numbers<[1], [0], [0], [1], [0, 0, 1, 1], [], []>} : vector<128x256xbf16>, vector<256x256xbf16>, vector<128x256xf32> -> vector<128x256xf32>
    %c0_9 = arith.constant 0 : index
    %c0_10 = arith.constant 0 : index
    %11 = vector.load %arg6[%c0_9, %c0_10] : memref<1x256xf32, #tpu.memory_space<vmem>>, vector<1x256xf32>
    %12 = vector.broadcast %11 : vector<1x256xf32> to vector<128x256xf32>
    %13 = arith.addf %10, %12 : vector<128x256xf32>
    %cst_11 = arith.constant 0.000000e+00 : f32
    %14 = vector.broadcast %cst_11 : f32 to vector<128x256xf32>
    %15 = arith.maximumf %13, %14 : vector<128x256xf32>
    %16 = arith.truncf %15 : vector<128x256xf32> to vector<128x256xbf16>
    %c0_12 = arith.constant 0 : index
    %c0_13 = arith.constant 0 : index
    %17 = vector.load %arg7[%c0_12, %c0_13] : memref<256x33xbf16, #tpu.memory_space<vmem>>, vector<256x33xbf16>
    %cst_14 = arith.constant dense<0.000000e+00> : vector<128x33xf32>
    %18 = tpu.matmul %16, %17, %cst_14 {dimension_numbers = #tpu.dot_dimension_numbers<[1], [0], [0], [1], [0, 0, 1, 1], [], []>} : vector<128x256xbf16>, vector<256x33xbf16>, vector<128x33xf32> -> vector<128x33xf32>
    %c0_15 = arith.constant 0 : index
    %c0_16 = arith.constant 0 : index
    %19 = vector.load %arg8[%c0_15, %c0_16] : memref<1x33xf32, #tpu.memory_space<vmem>>, vector<1x33xf32>
    %20 = vector.broadcast %19 : vector<1x33xf32> to vector<128x33xf32>
    %21 = arith.addf %18, %20 : vector<128x33xf32>
    %22 = vector.extract_strided_slice %21 {offsets = [0, 0], sizes = [128, 32], strides = [1, 1]} : vector<128x33xf32> to vector<128x32xf32>
    %23 = vector.extract_strided_slice %21 {offsets = [0, 32], sizes = [128, 1], strides = [1, 1]} : vector<128x33xf32> to vector<128x1xf32>
    %24 = arith.negf %23 : vector<128x1xf32>
    %25 = math.exp %24 : vector<128x1xf32>
    %cst_17 = arith.constant 1.000000e+00 : f32
    %26 = vector.broadcast %cst_17 : f32 to vector<128x1xf32>
    %27 = arith.addf %26, %25 : vector<128x1xf32>
    %28 = arith.divf %26, %27 : vector<128x1xf32>
    %29 = arith.truncf %22 : vector<128x32xf32> to vector<128x32xbf16>
    %c0_18 = arith.constant 0 : index
    %c0_19 = arith.constant 0 : index
    %30 = vector.load %arg1[%c0_18, %c0_19] : memref<256x32xbf16, #tpu.memory_space<vmem>>, vector<256x32xbf16>
    %cst_20 = arith.constant dense<0.000000e+00> : vector<128x256xf32>
    %31 = tpu.matmul %29, %30, %cst_20 {dimension_numbers = #tpu.dot_dimension_numbers<[1], [1], [0], [0], [0, 0, 1, 0], [], []>} : vector<128x32xbf16>, vector<256x32xbf16>, vector<128x256xf32> -> vector<128x256xf32>
    %cst_21 = arith.constant dense<0xFF800000> : vector<128xf32>
    %32 = vector.multi_reduction <maximumf>, %31, %cst_21 [1] : vector<128x256xf32> to vector<128xf32>
    %33 = vector.shape_cast %32 : vector<128xf32> to vector<128x1xf32>
    %34 = vector.broadcast %33 : vector<128x1xf32> to vector<128x256xf32>
    %35 = arith.subf %31, %34 : vector<128x256xf32>
    %36 = math.exp %35 : vector<128x256xf32>
    %cst_22 = arith.constant dense<0.000000e+00> : vector<128xf32>
    %37 = vector.multi_reduction <add>, %36, %cst_22 [1] : vector<128x256xf32> to vector<128xf32>
    %38 = vector.shape_cast %37 : vector<128xf32> to vector<128x1xf32>
    %39 = tpu.reciprocal %38 : vector<128x1xf32> -> vector<128x1xf32>
    %40 = arith.mulf %39, %28 : vector<128x1xf32>
    %41 = vector.broadcast %40 : vector<128x1xf32> to vector<128x256xf32>
    %42 = arith.mulf %36, %41 : vector<128x256xf32>
    %43 = arith.truncf %42 : vector<128x256xf32> to vector<128x256xbf16>
    %44 = vector.extract_strided_slice %43 {offsets = [0, 0], sizes = [64, 256], strides = [1, 1]} : vector<128x256xbf16> to vector<64x256xbf16>
    %c0_23 = arith.constant 0 : index
    %c0_24 = arith.constant 0 : index
    %c0_25 = arith.constant 0 : index
    %45 = vector.load %arg2[%c0_23, %c0_24, %c0_25] : memref<2x128x256xbf16, #tpu.memory_space<vmem>>, vector<1x128x256xbf16>
    %46 = vector.shape_cast %45 : vector<1x128x256xbf16> to vector<128x256xbf16>
    %cst_26 = arith.constant dense<0.000000e+00> : vector<64x128xf32>
    %47 = tpu.matmul %44, %46, %cst_26 {dimension_numbers = #tpu.dot_dimension_numbers<[1], [1], [0], [0], [0, 0, 1, 0], [], []>} : vector<64x256xbf16>, vector<128x256xbf16>, vector<64x128xf32> -> vector<64x128xf32>
    %c0_27 = arith.constant 0 : index
    %c0_28 = arith.constant 0 : index
    %c0_29 = arith.constant 0 : index
    %48 = vector.load %arg9[%c0_27, %c0_28, %c0_29] : memref<2x64x128xf32, #tpu.memory_space<vmem>>, vector<1x64x128xf32>
    %49 = vector.shape_cast %48 : vector<1x64x128xf32> to vector<64x128xf32>
    %50 = vector.shape_cast %47 : vector<64x128xf32> to vector<1x64x128xf32>
    tpu.vector_store %arg9[%c0_27, %c0_28, %c0_29], %50 {strides = array<i32>} : memref<2x64x128xf32, #tpu.memory_space<vmem>>, vector<1x64x128xf32>,
    %51 = vector.extract_strided_slice %43 {offsets = [64, 0], sizes = [64, 256], strides = [1, 1]} : vector<128x256xbf16> to vector<64x256xbf16>
    %c1 = arith.constant 1 : index
    %c0_30 = arith.constant 0 : index
    %c0_31 = arith.constant 0 : index
    %52 = vector.load %arg2[%c1, %c0_30, %c0_31] : memref<2x128x256xbf16, #tpu.memory_space<vmem>>, vector<1x128x256xbf16>
    %53 = vector.shape_cast %52 : vector<1x128x256xbf16> to vector<128x256xbf16>
    %cst_32 = arith.constant dense<0.000000e+00> : vector<64x128xf32>
    %54 = tpu.matmul %51, %53, %cst_32 {dimension_numbers = #tpu.dot_dimension_numbers<[1], [1], [0], [0], [0, 0, 1, 0], [], []>} : vector<64x256xbf16>, vector<128x256xbf16>, vector<64x128xf32> -> vector<64x128xf32>
    %c1_33 = arith.constant 1 : index
    %c0_34 = arith.constant 0 : index
    %c0_35 = arith.constant 0 : index
    %55 = vector.load %arg9[%c1_33, %c0_34, %c0_35] : memref<2x64x128xf32, #tpu.memory_space<vmem>>, vector<1x64x128xf32>
    %56 = vector.shape_cast %55 : vector<1x64x128xf32> to vector<64x128xf32>
    %57 = vector.shape_cast %54 : vector<64x128xf32> to vector<1x64x128xf32>
    tpu.vector_store %arg9[%c1_33, %c0_34, %c0_35], %57 {strides = array<i32>} : memref<2x64x128xf32, #tpu.memory_space<vmem>>, vector<1x64x128xf32>,
    return
  }
}

</mosaic_0001>

<bundles_post_ra>
// kernel: tpu_custom_call.1
= control target key start
LH: loop header
LB: loop body
LE: loop exit
PB: predicated region body
PF: predicated region fallthrough
CT: control target
= control target key end

     0   :  { %14 = vsyncpa [#allocation3], 0  ;;  %s3498_s0 = inlined_call_operand.vmem [shape: bf16[128,4], index: 0, kind: input, shape index: {}]   ;;  %s3499_s1 = inlined_call_operand.vmem [shape: bf16[256,32], index: 1, kind: input, shape index: {}]   ;;  %s3500_s2 = inlined_call_operand.vmem [shape: bf16[2,128,256], index: 2, kind: input, shape index: {}]   ;;  %s3501_s3 = inlined_call_operand.vmem [shape: bf16[4,256], index: 3, kind: input, shape index: {}]   ;;  %s3502_s4 = inlined_call_operand.vmem [shape: f32[1,256], index: 4, kind: input, shape index: {}]   ;;  %s3503_s5 = inlined_call_operand.hbm [shape: bf16[256,256], index: 5, kind: input, shape index: {}]   ;;  %s3504_s6 = inlined_call_operand.vmem [shape: f32[1,256], index: 6, kind: input, shape index: {}]   ;;  %s3505_s7 = inlined_call_operand.vmem [shape: bf16[256,33], index: 7, kind: input, shape index: {}]   ;;  %s3506_s8 = inlined_call_operand.vmem [shape: f32[1,33], index: 8, kind: input, shape index: {}]   ;;  %s3507_s9 = inlined_call_operand.hbm [shape: f32[2,64,128], index: 9, kind: output, shape index: {}]  }
   0x1   :  { %15 = vsyncpa [#allocation4], 0  ;;  %s2654_s30 = smov [#allocation2]   ;;  %s2606_s13 = scalar_lea.hbm %s3503_s5, 4096 }
   0x2   :  { %s31_s10 = sshll.u32 %s2654_s30, 4  ;;  %p2607_p0 = scmp.ne.s32.totalorder %s3503_s5, %s2606_s13  ;;  %s32_s10 = int_to_ptr.vmem [resolvable:$true] %s31_s10 }
   0x3   :  { %p2610_p1 = scmp.lt.u32.totalorder %s2606_s13, %s3503_s5 }
   0x5   :  { %p2612_p2 = pnand %p2610_p1, %p2607_p0 }
   0x7   :  { %2615 = shalt.err (!%p2612_p2)
}
   0x8   :  { %s2616_s18 = scalar_lea.vmem %s32_s10, 4096  ;;  %p2621_p4 = scmp.lt.s32.totalorder %s32_s10, %s32_s10 }
   0x9   :  { %p2617_p3 = scmp.ne.s32.totalorder %s32_s10, %s2616_s18  ;;  %p2622_p5 = scmp.lt.s32.totalorder %s2616_s18, %s2616_s18 }
   0xb   :  { %p2623_p6 = por %p2622_p5, %p2621_p4 }
   0xd   :  { %p2624_p7 = pnand %p2623_p6, %p2617_p3 }
   0xf   :  { %2627 = shalt.err (!%p2624_p7)
}
  0x10   :  { %s2655_s19 = smov 128   ;;  %s2656_s20 = smov 8  }
  0x11   :  { %37 = dma.hbm_to_vmem [thread:$0]  %s3503_s5, 4096, %s32_s10, [#allocation3], %s2655_s19, %s2655_s19, %s2656_s20  }
  0x12   :  { %2650 = dma.done.wait [#allocation3], 4096  }
  0x13   :  { %2651 = vsyncadd [#allocation3], 4294963200  ;;  %v2657_v0 = vmov 0   ;;  %vm151_vm0 = vcmask 1041408   ;;  %v2310_v4 = vld [vmem:[%s3498_s0] sm:$0xff]   ;;  %vm126_vm1 = vcmask 31744   ;;  %v67_v58 = vlaneseq }
  0x14   :  { %190 = vmatprep.mubr.bf16.mxu0 %v2657_v0  ;;  %v2035_v1 = vld.sshfl [vmem:[%s3501_s3] sm:$0x33 pattern:$0x76325410]  ;;  %v2318_v5 = vld [vmem:[#allocation2 + $0x4] ss:$8 sps:$4 sm:$0xff]  }
  0x15   :  { %v125_v2 = vcombine.high %v2035_v1, %v2035_v1  ;;  %v153_v3 = vsel %vm151_vm0, %v2035_v1, 0  ;;  %v2320_v6 = vld [vmem:[#allocation2] ss:$8 sps:$4 sm:$0xff]   ;;  %v2321_v7 = vld [vmem:[#allocation2 + $0x14] ss:$8 sps:$4 sm:$0xff]   ;;  %523 = vmatprep.subr.bf16.mxu1 %v2318_v5  ;;  %v2810_v59 = vshrl.u32 %v67_v58, 7 }
  0x16   :  { %v2311_v8 = vld [vmem:[%s3498_s0 + $0x8] sm:$0xff]   ;;  %524 = vmatpush1.bf16.msra.mxu1 %v2320_v6  ;;  %v2323_v9 = vld [vmem:[#allocation2 + $0x10] ss:$8 sps:$4 sm:$0xff]   ;;  %v2327_v12 = vld [vmem:[#allocation2 + $0x34] ss:$8 sps:$4 sm:$0xff]   ;;  %vm1132_vm2 = vcmask 261120  }
  0x17   :  { %2036 = vmatprep.subr.msk.bf16.mxu0 %vm151_vm0, %v125_v2  ;;  %525 = vmatprep.subr.bf16.mxu1 %v2321_v7  ;;  %v2324_v10 = vld [vmem:[#allocation2 + $0x24] ss:$8 sps:$4 sm:$0xff]   ;;  %v2326_v11 = vld [vmem:[#allocation2 + $0x20] ss:$8 sps:$4 sm:$0xff]   ;;  %v2329_v14 = vld [vmem:[#allocation2 + $0x30] ss:$8 sps:$4 sm:$0xff]  }
  0x18   :  { %159 = vmatpush1.bf16.msra.mxu0 %v153_v3  ;;  %v2312_v13 = vld [vmem:[%s3498_s0 + $0x10] sm:$0xff]   ;;  %v2313_v17 = vld [vmem:[%s3498_s0 + $0x18] sm:$0xff]   ;;  %v2314_v23 = vld [vmem:[%s3498_s0 + $0x20] sm:$0xff]   ;;  %v69_v60 = vsub.s32 0, %v2810_v59  ;;  %v73_v62 = vsub.s32 1, %v2810_v59 }
  0x19   :  { %v2330_v15 = vld [vmem:[#allocation2 + $0x44] ss:$8 sps:$4 sm:$0xff]   ;;  %v2332_v16 = vld [vmem:[#allocation2 + $0x40] ss:$8 sps:$4 sm:$0xff]   ;;  %v2333_v18 = vld [vmem:[#allocation2 + $0x54] ss:$8 sps:$4 sm:$0xff]  }
  0x1a   :  { %526 = vmatpush1.bf16.msra.mxu1 %v2323_v9  ;;  %v2335_v19 = vld [vmem:[#allocation2 + $0x50] ss:$8 sps:$4 sm:$0xff]   ;;  %v2336_v20 = vld [vmem:[#allocation2 + $0x64] ss:$8 sps:$4 sm:$0xff]   ;;  %v2338_v21 = vld [vmem:[#allocation2 + $0x60] ss:$8 sps:$4 sm:$0xff]  }
  0x1b   :  { %2037 = vmatmul.mubr.msk.bf16.vlgmr.msra.gmra.mrb[0].mxu0 %vm126_vm1, %v2310_v4  ;;  %527 = vmatprep.subr.bf16.mxu1 %v2324_v10  ;;  %v2339_v22 = vld [vmem:[#allocation2 + $0x74] ss:$8 sps:$4 sm:$0xff]   ;;  %v2341_v24 = vld [vmem:[#allocation2 + $0x70] ss:$8 sps:$4 sm:$0xff]   ;;  %v2342_v25 = vld [vmem:[#allocation2 + $0x84] ss:$8 sps:$4 sm:$0xff]  }
  0x1c   :  { %200 = vmatprep.mubr.bf16.mxu0 %v2657_v0  ;;  %v2344_v26 = vld [vmem:[#allocation2 + $0x80] ss:$8 sps:$4 sm:$0xff]   ;;  %v2345_v27 = vld [vmem:[#allocation2 + $0x94] ss:$8 sps:$4 sm:$0xff]   ;;  %v2347_v29 = vld [vmem:[#allocation2 + $0x90] ss:$8 sps:$4 sm:$0xff]  }
  0x1d   :  { %v2315_v28 = vld [vmem:[%s3498_s0 + $0x28] sm:$0xff]   ;;  %v2351_v32 = vld [vmem:[#allocation2 + $0xb4] ss:$8 sps:$4 sm:$0xff]   ;;  %v2316_v33 = vld [vmem:[%s3498_s0 + $0x30] sm:$0xff]  }
  0x1e   :  { %528 = vmatpush1.bf16.msra.mxu1 %v2326_v11  ;;  %v2348_v30 = vld [vmem:[#allocation2 + $0xa4] ss:$8 sps:$4 sm:$0xff]   ;;  %v2350_v31 = vld [vmem:[#allocation2 + $0xa0] ss:$8 sps:$4 sm:$0xff]   ;;  %v2353_v34 = vld [vmem:[#allocation2 + $0xb0] ss:$8 sps:$4 sm:$0xff]  }
  0x1f   :  { %529 = vmatprep.subr.bf16.mxu1 %v2327_v12  ;;  %v2354_v35 = vld [vmem:[#allocation2 + $0xc4] ss:$8 sps:$4 sm:$0xff]   ;;  %v2356_v36 = vld [vmem:[#allocation2 + $0xc0] ss:$8 sps:$4 sm:$0xff]   ;;  %v2357_v37 = vld [vmem:[#allocation2 + $0xd4] ss:$8 sps:$4 sm:$0xff]  }
  0x20   :  { %v2317_v38 = vld [vmem:[%s3498_s0 + $0x38] sm:$0xff]   ;;  %v2360_v40 = vld [vmem:[#allocation2 + $0xe4] ss:$8 sps:$4 sm:$0xff]   ;;  %v2362_v41 = vld [vmem:[#allocation2 + $0xe0] ss:$8 sps:$4 sm:$0xff]  }
  0x21   :  { %v2359_v39 = vld [vmem:[#allocation2 + $0xd0] ss:$8 sps:$4 sm:$0xff]   ;;  %v2363_v42 = vld [vmem:[#allocation2 + $0xf4] ss:$8 sps:$4 sm:$0xff]   ;;  %v2368_v46 = vld [vmem:[%s3505_s7 + $0x48] sm:$0xff]  }
  0x22   :  { %530 = vmatpush1.bf16.msra.mxu1 %v2329_v14  ;;  %v2365_v43 = vld [vmem:[#allocation2 + $0xf0] ss:$8 sps:$4 sm:$0xff]   ;;  %v2369_v47 = vld [vmem:[%s3505_s7 + $0x8] sm:$0xff]   ;;  %v2370_v48 = vld [vmem:[%s3505_s7 + $0x50] sm:$0xff]  }
  0x23   :  { %2038 = vmatmul.mubr.msk.bf16.gmra.mrb[4].mxu0 %vm126_vm1, %v2311_v8  ;;  %531 = vmatprep.subr.bf16.mxu1 %v2330_v15  ;;  %v2366_v44 = vld [vmem:[%s3505_s7 + $0x40] sm:$0xff]   ;;  %v2371_v49 = vld [vmem:[%s3505_s7 + $0x10] sm:$0xff]   ;;  %v2372_v50 = vld [vmem:[%s3505_s7 + $0x58] sm:$0xff]  }
  0x24   :  { %210 = vmatprep.mubr.bf16.mxu0 %v2657_v0  ;;  %v2367_v45 = vld [vmem:[%s3505_s7] sm:$0xff]   ;;  %2182 = vmatprep.subr.bf16.mxu0 %v2366_v44  ;;  %v2373_v51 = vld [vmem:[%s3505_s7 + $0x18] sm:$0xff]   ;;  %v2376_v54 = vld [vmem:[%s3505_s7 + $0x68] sm:$0xff]  }
  0x25   :  { %2183 = vmatpush3.bf16.msra.mxu0 %v2367_v45  ;;  %v2374_v52 = vld [vmem:[%s3505_s7 + $0x60] sm:$0xff]   ;;  %v2377_v55 = vld [vmem:[%s3505_s7 + $0x28] sm:$0xff]   ;;  %v2378_v56 = vld [vmem:[%s3505_s7 + $0x70] sm:$0xff]  }
  0x26   :  { %532 = vmatpush1.bf16.msra.mxu1 %v2332_v16  ;;  %2184 = vmatprep.subr.bf16.mxu0 %v2368_v46  ;;  %v2375_v53 = vld [vmem:[%s3505_s7 + $0x20] sm:$0xff]   ;;  %v2379_v57 = vld [vmem:[%s3505_s7 + $0x30] sm:$0xff]  }
  0x27   :  { %533 = vmatprep.subr.bf16.mxu1 %v2333_v18  ;;  %v65_v61 = vld [vmem:[%s3502_s4] sm:$0x3] }
  0x28   :  { %v2819_v63 = vrot.slane %v65_v61, %v69_v60 }
  0x29   :  { %2185 = vmatpush3.bf16.msra.mxu0 %v2369_v47 }
  0x2a   :  { %534 = vmatpush1.bf16.msra.mxu1 %v2335_v19  ;;  %2186 = vmatprep.subr.bf16.mxu0 %v2370_v48 }
  0x2b   :  { %2039 = vmatmul.mubr.msk.bf16.gmra.mrb[8].mxu0 %vm126_vm1, %v2312_v13  ;;  %535 = vmatprep.subr.bf16.mxu1 %v2336_v20 }
  0x2c   :  { %220 = vmatprep.mubr.bf16.mxu0 %v2657_v0 }
  0x2d   :  { %2187 = vmatpush3.bf16.msra.mxu0 %v2371_v49 }
  0x2e   :  { %536 = vmatpush1.bf16.msra.mxu1 %v2338_v21  ;;  %2188 = vmatprep.subr.bf16.mxu0 %v2372_v50 }
  0x2f   :  { %537 = vmatprep.subr.bf16.mxu1 %v2339_v22 }
  0x31   :  { %2189 = vmatpush3.bf16.msra.mxu0 %v2373_v51 }
  0x32   :  { %538 = vmatpush1.bf16.msra.mxu1 %v2341_v24  ;;  %2190 = vmatprep.subr.bf16.mxu0 %v2374_v52 }
  0x33   :  { %2040 = vmatmul.mubr.msk.bf16.gmra.mrb[12].mxu0 %vm126_vm1, %v2313_v17  ;;  %539 = vmatprep.subr.bf16.mxu1 %v2342_v25 }
  0x34   :  { %230 = vmatprep.mubr.bf16.mxu0 %v2657_v0 }
  0x35   :  { %2191 = vmatpush3.bf16.msra.mxu0 %v2375_v53 }
  0x36   :  { %540 = vmatpush1.bf16.msra.mxu1 %v2344_v26  ;;  %2192 = vmatprep.subr.bf16.mxu0 %v2376_v54 }
  0x37   :  { %541 = vmatprep.subr.bf16.mxu1 %v2345_v27 }
  0x39   :  { %2193 = vmatpush3.bf16.msra.mxu0 %v2377_v55 }
  0x3a   :  { %542 = vmatpush1.bf16.msra.mxu1 %v2347_v29  ;;  %2194 = vmatprep.subr.bf16.mxu0 %v2378_v56 }
  0x3b   :  { %2041 = vmatmul.mubr.msk.bf16.gmra.mrb[16].mxu0 %vm126_vm1, %v2314_v23  ;;  %543 = vmatprep.subr.bf16.mxu1 %v2348_v30 }
  0x3c   :  { %240 = vmatprep.mubr.bf16.mxu0 %v2657_v0 }
  0x3d   :  { %2195 = vmatpush3.bf16.msra.mxu0 %v2379_v57 }
  0x3e   :  { %544 = vmatpush1.bf16.msra.mxu1 %v2350_v31 }
  0x3f   :  { %545 = vmatprep.subr.bf16.mxu1 %v2351_v32 }
  0x42   :  { %546 = vmatpush1.bf16.msra.mxu1 %v2353_v34 }
  0x43   :  { %2042 = vmatmul.mubr.msk.bf16.gmra.mrb[20].mxu0 %vm126_vm1, %v2315_v28  ;;  %547 = vmatprep.subr.bf16.mxu1 %v2354_v35 }
  0x44   :  { %250 = vmatprep.mubr.bf16.mxu0 %v2657_v0 }
  0x46   :  { %548 = vmatpush1.bf16.msra.mxu1 %v2356_v36 }
  0x47   :  { %549 = vmatprep.subr.bf16.mxu1 %v2357_v37 }
  0x4a   :  { %550 = vmatpush1.bf16.msra.mxu1 %v2359_v39 }
  0x4b   :  { %2043 = vmatmul.mubr.msk.bf16.gmra.mrb[24].mxu0 %vm126_vm1, %v2316_v33  ;;  %551 = vmatprep.subr.bf16.mxu1 %v2360_v40 }
  0x4c   :  { %260 = vmatprep.mubr.bf16.mxu0 %v2657_v0  ;;  %v2823_v0 = vrot.slane %v65_v61, %v73_v62 }
  0x4e   :  { %552 = vmatpush1.bf16.msra.mxu1 %v2362_v41 }
  0x4f   :  { %553 = vmatprep.subr.bf16.mxu1 %v2363_v42 }
  0x52   :  { %554 = vmatpush1.bf16.msra.mxu1 %v2365_v43 }
  0x53   :  { %2044 = vmatmul.mubr.msk.bf16.gmra.mrb[28].mxu0 %vm126_vm1, %v2317_v38 }
  0xee   :  { %v192_v1 = vpop.f32.mrb[0].mxu0 }
  0xef   :  { %v193_v2 = vadd.f32 %v192_v1, %v2819_v63  ;;  %v194_v3 = vpop.f32.mrb[1].mxu0 }
  0xf0   :  { %v195_v4 = vadd.f32 %v194_v3, %v2823_v0  ;;  %v196_v5 = vpop.f32.mrb[2].mxu0 }
  0xf1   :  { %v197_v6 = vadd.f32 %v196_v5, %v2819_v63  ;;  %v198_v7 = vpop.f32.mrb[3].mxu0  ;;  %v271_v9 = vmax.f32 %v193_v2, 0.0 }
  0xf2   :  { %v199_v8 = vadd.f32 %v198_v7, %v2823_v0  ;;  %v272_v11 = vmax.f32 %v195_v4, 0.0 }
  0xf3   :  { %v273_v10 = vmax.f32 %v197_v6, 0.0 }
  0xf4   :  { %v274_v12 = vmax.f32 %v199_v8, 0.0 }
  0xf5   :  { %v303_v13 = vpack.c.bf16 %v273_v10, %v271_v9 }
  0xf6   :  { %v202_v14 = vpop.f32.mrb[4].mxu0  ;;  %v304_v15 = vpack.c.bf16 %v274_v12, %v272_v11 }
  0xf7   :  { %v203_v16 = vadd.f32 %v202_v14, %v2819_v63  ;;  %v204_v17 = vpop.f32.mrb[5].mxu0 }
  0xf8   :  { %v205_v18 = vadd.f32 %v204_v17, %v2823_v0  ;;  %v206_v19 = vpop.f32.mrb[6].mxu0  ;;  %555 = vmatprep.mubr.bf16.mxu1 %v304_v15 }
  0xf9   :  { %v207_v20 = vadd.f32 %v206_v19, %v2819_v63  ;;  %v208_v21 = vpop.f32.mrb[7].mxu0  ;;  %556 = vmatmul.mubr.bf16.vlgmr.msra.gmra.mrb[0].mxu1 %v303_v13  ;;  %v275_v23 = vmax.f32 %v203_v16, 0.0 }
  0xfa   :  { %v209_v22 = vadd.f32 %v208_v21, %v2823_v0  ;;  %v276_v25 = vmax.f32 %v205_v18, 0.0 }
  0xfb   :  { %v277_v24 = vmax.f32 %v207_v20, 0.0 }
  0xfc   :  { %v278_v26 = vmax.f32 %v209_v22, 0.0 }
  0xfd   :  { %v305_v27 = vpack.c.bf16 %v277_v24, %v275_v23 }
  0xfe   :  { %v306_v28 = vpack.c.bf16 %v278_v26, %v276_v25  ;;  %v212_v29 = vpop.f32.mrb[8].mxu0 }
  0xff   :  { %v213_v30 = vadd.f32 %v212_v29, %v2819_v63  ;;  %v214_v31 = vpop.f32.mrb[9].mxu0 }
 0x100   :  { %v215_v32 = vadd.f32 %v214_v31, %v2823_v0  ;;  %v216_v33 = vpop.f32.mrb[10].mxu0  ;;  %565 = vmatprep.mubr.bf16.mxu1 %v306_v28 }
 0x101   :  { %v217_v34 = vadd.f32 %v216_v33, %v2819_v63  ;;  %v218_v35 = vpop.f32.mrb[11].mxu0  ;;  %566 = vmatmul.mubr.bf16.gmra.mrb[4].mxu1 %v305_v27  ;;  %v279_v37 = vmax.f32 %v213_v30, 0.0 }
 0x102   :  { %v219_v36 = vadd.f32 %v218_v35, %v2823_v0  ;;  %v280_v39 = vmax.f32 %v215_v32, 0.0 }
 0x103   :  { %v281_v38 = vmax.f32 %v217_v34, 0.0 }
 0x104   :  { %v282_v40 = vmax.f32 %v219_v36, 0.0 }
 0x105   :  { %v307_v41 = vpack.c.bf16 %v281_v38, %v279_v37 }
 0x106   :  { %v308_v42 = vpack.c.bf16 %v282_v40, %v280_v39  ;;  %v222_v43 = vpop.f32.mrb[12].mxu0 }
 0x107   :  { %v223_v44 = vadd.f32 %v222_v43, %v2819_v63  ;;  %v224_v45 = vpop.f32.mrb[13].mxu0 }
 0x108   :  { %v225_v46 = vadd.f32 %v224_v45, %v2823_v0  ;;  %v226_v47 = vpop.f32.mrb[14].mxu0  ;;  %575 = vmatprep.mubr.bf16.mxu1 %v308_v42 }
 0x109   :  { %v227_v48 = vadd.f32 %v226_v47, %v2819_v63  ;;  %v228_v49 = vpop.f32.mrb[15].mxu0  ;;  %576 = vmatmul.mubr.bf16.gmra.mrb[8].mxu1 %v307_v41  ;;  %v283_v51 = vmax.f32 %v223_v44, 0.0 }
 0x10a   :  { %v229_v50 = vadd.f32 %v228_v49, %v2823_v0  ;;  %v284_v53 = vmax.f32 %v225_v46, 0.0 }
 0x10b   :  { %v285_v52 = vmax.f32 %v227_v48, 0.0 }
 0x10c   :  { %v286_v54 = vmax.f32 %v229_v50, 0.0 }
 0x10d   :  { %v309_v55 = vpack.c.bf16 %v285_v52, %v283_v51 }
 0x10e   :  { %v310_v56 = vpack.c.bf16 %v286_v54, %v284_v53  ;;  %v232_v57 = vpop.f32.mrb[16].mxu0  ;;  %v2380_v54 = vld [vmem:[%s3505_s7 + $0x78] sm:$0xff]  }
 0x10f   :  { %v233_v58 = vadd.f32 %v232_v57, %v2819_v63  ;;  %v234_v61 = vpop.f32.mrb[17].mxu0  ;;  %2196 = vmatprep.subr.bf16.mxu0 %v2380_v54 }
 0x110   :  { %v235_v1 = vadd.f32 %v234_v61, %v2823_v0  ;;  %v236_v2 = vpop.f32.mrb[18].mxu0  ;;  %585 = vmatprep.mubr.bf16.mxu1 %v310_v56  ;;  %v2384_v56 = vld [vmem:[%s3499_s1 + $0x48] sm:$0xff]  }
 0x111   :  { %v237_v3 = vadd.f32 %v236_v2, %v2819_v63  ;;  %v238_v4 = vpop.f32.mrb[19].mxu0  ;;  %586 = vmatmul.mubr.bf16.gmra.mrb[12].mxu1 %v309_v55  ;;  %v287_v6 = vmax.f32 %v233_v58, 0.0  ;;  %v2381_v55 = vld [vmem:[%s3505_s7 + $0x38] sm:$0xff]   ;;  %v2385_v58 = vld [vmem:[%s3499_s1 + $0x8] sm:$0xff]   ;;  %v2387_v2 = vld [vmem:[%s3499_s1 + $0x10] sm:$0xff]  }
 0x112   :  { %v239_v5 = vadd.f32 %v238_v4, %v2823_v0  ;;  %v288_v8 = vmax.f32 %v235_v1, 0.0  ;;  %2197 = vmatpush3.bf16.msra.mxu0 %v2381_v55  ;;  %v1161_v61 = vsel %vm1132_vm2, %v2385_v58, 0  ;;  %v2386_v1 = vld [vmem:[%s3499_s1 + $0x50] sm:$0xff]   ;;  %v2388_v4 = vld [vmem:[%s3499_s1 + $0x58] sm:$0xff]  }
 0x113   :  { %v289_v7 = vmax.f32 %v237_v3, 0.0  ;;  %v1164_v3 = vsel %vm1132_vm2, %v2387_v2, 0 }
 0x114   :  { %v290_v9 = vmax.f32 %v239_v5, 0.0  ;;  %v2389_v5 = vld [vmem:[%s3499_s1 + $0x18] sm:$0xff]  }
 0x115   :  { %v311_v10 = vpack.c.bf16 %v289_v7, %v287_v6  ;;  %v1167_v6 = vsel %vm1132_vm2, %v2389_v5, 0  ;;  %v2390_v7 = vld [vmem:[%s3499_s1 + $0x60] sm:$0xff]  }
 0x116   :  { %v312_v11 = vpack.c.bf16 %v290_v9, %v288_v8  ;;  %v242_v12 = vpop.f32.mrb[20].mxu0  ;;  %v2391_v8 = vld [vmem:[%s3499_s1 + $0x20] sm:$0xff]  }
 0x117   :  { %v243_v13 = vadd.f32 %v242_v12, %v2819_v63  ;;  %v244_v14 = vpop.f32.mrb[21].mxu0  ;;  %v1170_v9 = vsel %vm1132_vm2, %v2391_v8, 0 }
 0x118   :  { %v245_v15 = vadd.f32 %v244_v14, %v2823_v0  ;;  %v246_v16 = vpop.f32.mrb[22].mxu0  ;;  %595 = vmatprep.mubr.bf16.mxu1 %v312_v11  ;;  %v2393_v11 = vld [vmem:[%s3499_s1 + $0x28] sm:$0xff]   ;;  %v2395_v14 = vld [vmem:[%s3499_s1 + $0x30] sm:$0xff]  }
 0x119   :  { %v247_v17 = vadd.f32 %v246_v16, %v2819_v63  ;;  %v248_v18 = vpop.f32.mrb[23].mxu0  ;;  %596 = vmatmul.mubr.bf16.gmra.mrb[16].mxu1 %v311_v10  ;;  %v291_v20 = vmax.f32 %v243_v13, 0.0  ;;  %v2392_v10 = vld [vmem:[%s3499_s1 + $0x68] sm:$0xff]   ;;  %v1173_v12 = vsel %vm1132_vm2, %v2393_v11, 0  ;;  %v2394_v13 = vld [vmem:[%s3499_s1 + $0x70] sm:$0xff]  }
 0x11a   :  { %v249_v19 = vadd.f32 %v248_v18, %v2823_v0  ;;  %v292_v22 = vmax.f32 %v245_v15, 0.0  ;;  %v1176_v15 = vsel %vm1132_vm2, %v2395_v14, 0  ;;  %v351_v16 = vld [vmem:[%s3504_s6] sm:$0x3] }
 0x11b   :  { %v293_v21 = vmax.f32 %v247_v17, 0.0  ;;  %v2924_v17 = vrot.slane %v351_v16, %v69_v60  ;;  %v2928_v18 = vrot.slane %v351_v16, %v73_v62 }
 0x11c   :  { %v294_v23 = vmax.f32 %v249_v19, 0.0 }
 0x11d   :  { %v313_v24 = vpack.c.bf16 %v293_v21, %v291_v20 }
 0x11e   :  { %v314_v25 = vpack.c.bf16 %v294_v23, %v292_v22  ;;  %v252_v26 = vpop.f32.mrb[24].mxu0 }
 0x11f   :  { %v253_v27 = vadd.f32 %v252_v26, %v2819_v63  ;;  %v254_v28 = vpop.f32.mrb[25].mxu0 }
 0x120   :  { %v255_v29 = vadd.f32 %v254_v28, %v2823_v0  ;;  %v256_v30 = vpop.f32.mrb[26].mxu0  ;;  %605 = vmatprep.mubr.bf16.mxu1 %v314_v25 }
 0x121   :  { %v257_v31 = vadd.f32 %v256_v30, %v2819_v63  ;;  %v258_v32 = vpop.f32.mrb[27].mxu0  ;;  %606 = vmatmul.mubr.bf16.gmra.mrb[20].mxu1 %v313_v24  ;;  %v295_v34 = vmax.f32 %v253_v27, 0.0 }
 0x122   :  { %v259_v33 = vadd.f32 %v258_v32, %v2823_v0  ;;  %v296_v36 = vmax.f32 %v255_v29, 0.0 }
 0x123   :  { %v297_v35 = vmax.f32 %v257_v31, 0.0 }
 0x124   :  { %v298_v37 = vmax.f32 %v259_v33, 0.0 }
 0x125   :  { %v315_v38 = vpack.c.bf16 %v297_v35, %v295_v34 }
 0x126   :  { %v316_v39 = vpack.c.bf16 %v298_v37, %v296_v36  ;;  %v262_v40 = vpop.f32.mrb[28].mxu0 }
 0x127   :  { %v263_v41 = vadd.f32 %v262_v40, %v2819_v63  ;;  %v264_v42 = vpop.f32.mrb[29].mxu0 }
 0x128   :  { %v265_v43 = vadd.f32 %v264_v42, %v2823_v0  ;;  %v266_v44 = vpop.f32.mrb[30].mxu0  ;;  %615 = vmatprep.mubr.bf16.mxu1 %v316_v39 }
 0x129   :  { %v299_v45 = vmax.f32 %v263_v41, 0.0  ;;  %v267_v46 = vadd.f32 %v266_v44, %v2819_v63  ;;  %v268_v47 = vpop.f32.mrb[31].mxu0  ;;  %616 = vmatmul.mubr.bf16.gmra.mrb[24].mxu1 %v315_v38  ;;  %v2382_v63 = vld [vmem:[%s3499_s1 + $0x40] sm:$0xff]  }
 0x12a   :  { %v300_v48 = vmax.f32 %v265_v43, 0.0  ;;  %v269_v49 = vadd.f32 %v268_v47, %v2823_v0  ;;  %v2383_v0 = vld [vmem:[%s3499_s1] sm:$0xff]   ;;  %2294 = vmatprep.subr.msk.bf16.mxu1 %vm1132_vm2, %v2382_v63 }
 0x12b   :  { %v301_v50 = vmax.f32 %v267_v46, 0.0  ;;  %v1158_v57 = vsel %vm1132_vm2, %v2383_v0, 0 }
 0x12c   :  { %v302_v51 = vmax.f32 %v269_v49, 0.0  ;;  %2247 = vmatpush3.bf16.xpose.msra.mxu1 %v1158_v57 }
 0x12d   :  { %v317_v52 = vpack.c.bf16 %v301_v50, %v299_v45  ;;  %2295 = vmatprep.subr.msk.bf16.mxu1 %vm1132_vm2, %v2384_v56 }
 0x12e   :  { %v318_v53 = vpack.c.bf16 %v302_v51, %v300_v48 }
 0x130   :  { %625 = vmatprep.mubr.bf16.mxu1 %v318_v53 }
 0x131   :  { %626 = vmatmul.mubr.bf16.gmra.mrb[28].mxu1 %v317_v52 }
 0x134   :  { %2249 = vmatpush3.bf16.xpose.msra.mxu1 %v1161_v61 }
 0x135   :  { %2296 = vmatprep.subr.msk.bf16.mxu1 %vm1132_vm2, %v2386_v1 }
 0x13c   :  { %2251 = vmatpush3.bf16.xpose.msra.mxu1 %v1164_v3 }
 0x13d   :  { %2297 = vmatprep.subr.msk.bf16.mxu1 %vm1132_vm2, %v2388_v4 }
 0x144   :  { %2253 = vmatpush3.bf16.xpose.msra.mxu1 %v1167_v6 }
 0x145   :  { %2298 = vmatprep.subr.msk.bf16.mxu1 %vm1132_vm2, %v2390_v7 }
 0x14c   :  { %2255 = vmatpush3.bf16.xpose.msra.mxu1 %v1170_v9 }
 0x14d   :  { %2299 = vmatprep.subr.msk.bf16.mxu1 %vm1132_vm2, %v2392_v10 }
 0x154   :  { %2257 = vmatpush3.bf16.xpose.msra.mxu1 %v1173_v12 }
 0x155   :  { %2300 = vmatprep.subr.msk.bf16.mxu1 %vm1132_vm2, %v2394_v13 }
 0x15c   :  { %2259 = vmatpush3.bf16.xpose.msra.mxu1 %v1176_v15 }
 0x1cc   :  { %v557_v19 = vpop.f32.mrb[0].mxu1 }
 0x1cd   :  { %v558_v20 = vadd.f32 %v557_v19, %v2924_v17  ;;  %v559_v21 = vpop.f32.mrb[1].mxu1 }
 0x1ce   :  { %v560_v22 = vadd.f32 %v559_v21, %v2928_v18  ;;  %v561_v23 = vpop.f32.mrb[2].mxu1 }
 0x1cf   :  { %v562_v24 = vadd.f32 %v561_v23, %v2924_v17  ;;  %v563_v25 = vpop.f32.mrb[3].mxu1  ;;  %v636_v27 = vmax.f32 %v558_v20, 0.0 }
 0x1d0   :  { %v564_v26 = vadd.f32 %v563_v25, %v2928_v18  ;;  %v637_v60 = vmax.f32 %v560_v22, 0.0 }
 0x1d1   :  { %v638_v28 = vmax.f32 %v562_v24, 0.0 }
 0x1d2   :  { %v639_v29 = vmax.f32 %v564_v26, 0.0 }
 0x1d3   :  { %v668_v30 = vpack.c.bf16 %v638_v28, %v636_v27 }
 0x1d4   :  { %v669_v59 = vpack.c.bf16 %v639_v29, %v637_v60  ;;  %v567_v62 = vpop.f32.mrb[4].mxu1 }
 0x1d5   :  { %v568_v31 = vadd.f32 %v567_v62, %v2924_v17  ;;  %v569_v32 = vpop.f32.mrb[5].mxu1 }
 0x1d6   :  { %v570_v33 = vadd.f32 %v569_v32, %v2928_v18  ;;  %v571_v34 = vpop.f32.mrb[6].mxu1  ;;  %851 = vmatprep.mubr.bf16.mxu0 %v669_v59 }
 0x1d7   :  { %v572_v35 = vadd.f32 %v571_v34, %v2924_v17  ;;  %v573_v36 = vpop.f32.mrb[7].mxu1  ;;  %852 = vmatmul.mubr.bf16.vlgmr.msra.gmra.mrb[32].mxu0 %v668_v30  ;;  %v640_v38 = vmax.f32 %v568_v31, 0.0 }
 0x1d8   :  { %v574_v37 = vadd.f32 %v573_v36, %v2928_v18  ;;  %v641_v40 = vmax.f32 %v570_v33, 0.0 }
 0x1d9   :  { %v642_v39 = vmax.f32 %v572_v35, 0.0 }
 0x1da   :  { %v643_v41 = vmax.f32 %v574_v37, 0.0 }
 0x1db   :  { %v670_v42 = vpack.c.bf16 %v642_v39, %v640_v38 }
 0x1dc   :  { %v671_v43 = vpack.c.bf16 %v643_v41, %v641_v40  ;;  %v577_v44 = vpop.f32.mrb[8].mxu1 }
 0x1dd   :  { %v578_v45 = vadd.f32 %v577_v44, %v2924_v17  ;;  %v579_v46 = vpop.f32.mrb[9].mxu1 }
 0x1de   :  { %v580_v47 = vadd.f32 %v579_v46, %v2928_v18  ;;  %v581_v48 = vpop.f32.mrb[10].mxu1  ;;  %859 = vmatprep.mubr.bf16.mxu0 %v671_v43 }
 0x1df   :  { %v582_v49 = vadd.f32 %v581_v48, %v2924_v17  ;;  %v583_v50 = vpop.f32.mrb[11].mxu1  ;;  %860 = vmatmul.mubr.bf16.gmra.mrb[36].mxu0 %v670_v42  ;;  %v644_v52 = vmax.f32 %v578_v45, 0.0 }
 0x1e0   :  { %v584_v51 = vadd.f32 %v583_v50, %v2928_v18  ;;  %v645_v54 = vmax.f32 %v580_v47, 0.0 }
 0x1e1   :  { %v646_v53 = vmax.f32 %v582_v49, 0.0 }
 0x1e2   :  { %v647_v55 = vmax.f32 %v584_v51, 0.0 }
 0x1e3   :  { %v672_v63 = vpack.c.bf16 %v646_v53, %v644_v52 }
 0x1e4   :  { %v673_v0 = vpack.c.bf16 %v647_v55, %v645_v54  ;;  %v587_v56 = vpop.f32.mrb[12].mxu1 }
 0x1e5   :  { %v588_v57 = vadd.f32 %v587_v56, %v2924_v17  ;;  %v589_v58 = vpop.f32.mrb[13].mxu1 }
 0x1e6   :  { %v590_v61 = vadd.f32 %v589_v58, %v2928_v18  ;;  %v591_v1 = vpop.f32.mrb[14].mxu1  ;;  %867 = vmatprep.mubr.bf16.mxu0 %v673_v0 }
 0x1e7   :  { %v592_v2 = vadd.f32 %v591_v1, %v2924_v17  ;;  %v593_v3 = vpop.f32.mrb[15].mxu1  ;;  %868 = vmatmul.mubr.bf16.gmra.mrb[40].mxu0 %v672_v63  ;;  %v648_v5 = vmax.f32 %v588_v57, 0.0 }
 0x1e8   :  { %v594_v4 = vadd.f32 %v593_v3, %v2928_v18  ;;  %v649_v7 = vmax.f32 %v590_v61, 0.0 }
 0x1e9   :  { %v650_v6 = vmax.f32 %v592_v2, 0.0 }
 0x1ea   :  { %v651_v8 = vmax.f32 %v594_v4, 0.0 }
 0x1eb   :  { %v674_v9 = vpack.c.bf16 %v650_v6, %v648_v5  ;;  %v2396_v5 = vld [vmem:[%s3499_s1 + $0x78] sm:$0xff]  }
 0x1ec   :  { %v675_v10 = vpack.c.bf16 %v651_v8, %v649_v7  ;;  %v597_v11 = vpop.f32.mrb[16].mxu1  ;;  %v2397_v6 = vld [vmem:[%s3499_s1 + $0x38] sm:$0xff]   ;;  %2301 = vmatprep.subr.msk.bf16.mxu1 %vm1132_vm2, %v2396_v5 }
 0x1ed   :  { %v598_v12 = vadd.f32 %v597_v11, %v2924_v17  ;;  %v599_v13 = vpop.f32.mrb[17].mxu1 }
 0x1ee   :  { %v600_v14 = vadd.f32 %v599_v13, %v2928_v18  ;;  %v601_v15 = vpop.f32.mrb[18].mxu1  ;;  %875 = vmatprep.mubr.bf16.mxu0 %v675_v10  ;;  %v2973_v10 = vld [vmem:[%s3506_s8] ss:$0 sm:$0xff] }
 0x1ef   :  { %v602_v16 = vadd.f32 %v601_v15, %v2924_v17  ;;  %v603_v19 = vpop.f32.mrb[19].mxu1  ;;  %876 = vmatmul.mubr.bf16.gmra.mrb[44].mxu0 %v674_v9  ;;  %v652_v21 = vmax.f32 %v598_v12, 0.0 }
 0x1f0   :  { %v604_v20 = vadd.f32 %v603_v19, %v2928_v18  ;;  %v653_v23 = vmax.f32 %v600_v14, 0.0 }
 0x1f1   :  { %v654_v22 = vmax.f32 %v602_v16, 0.0 }
 0x1f2   :  { %v655_v24 = vmax.f32 %v604_v20, 0.0 }
 0x1f3   :  { %v676_v25 = vpack.c.bf16 %v654_v22, %v652_v21 }
 0x1f4   :  { %v677_v26 = vpack.c.bf16 %v655_v24, %v653_v23  ;;  %v607_v27 = vpop.f32.mrb[20].mxu1 }
 0x1f5   :  { %v608_v28 = vadd.f32 %v607_v27, %v2924_v17  ;;  %v609_v60 = vpop.f32.mrb[21].mxu1 }
 0x1f6   :  { %v610_v29 = vadd.f32 %v609_v60, %v2928_v18  ;;  %v611_v30 = vpop.f32.mrb[22].mxu1  ;;  %883 = vmatprep.mubr.bf16.mxu0 %v677_v26 }
 0x1f7   :  { %v612_v59 = vadd.f32 %v611_v30, %v2924_v17  ;;  %v613_v62 = vpop.f32.mrb[23].mxu1  ;;  %884 = vmatmul.mubr.bf16.gmra.mrb[48].mxu0 %v676_v25  ;;  %v656_v32 = vmax.f32 %v608_v28, 0.0 }
 0x1f8   :  { %v614_v31 = vadd.f32 %v613_v62, %v2928_v18  ;;  %v657_v34 = vmax.f32 %v610_v29, 0.0 }
 0x1f9   :  { %v658_v33 = vmax.f32 %v612_v59, 0.0 }
 0x1fa   :  { %v659_v35 = vmax.f32 %v614_v31, 0.0 }
 0x1fb   :  { %v678_v36 = vpack.c.bf16 %v658_v33, %v656_v32 }
 0x1fc   :  { %v679_v37 = vpack.c.bf16 %v659_v35, %v657_v34  ;;  %v617_v38 = vpop.f32.mrb[24].mxu1 }
 0x1fd   :  { %v618_v39 = vadd.f32 %v617_v38, %v2924_v17  ;;  %v619_v40 = vpop.f32.mrb[25].mxu1 }
 0x1fe   :  { %v620_v41 = vadd.f32 %v619_v40, %v2928_v18  ;;  %v621_v42 = vpop.f32.mrb[26].mxu1  ;;  %891 = vmatprep.mubr.bf16.mxu0 %v679_v37 }
 0x1ff   :  { %v622_v43 = vadd.f32 %v621_v42, %v2924_v17  ;;  %v623_v44 = vpop.f32.mrb[27].mxu1  ;;  %892 = vmatmul.mubr.bf16.gmra.mrb[52].mxu0 %v678_v36  ;;  %v660_v46 = vmax.f32 %v618_v39, 0.0 }
 0x200   :  { %v624_v45 = vadd.f32 %v623_v44, %v2928_v18  ;;  %v661_v48 = vmax.f32 %v620_v41, 0.0 }
 0x201   :  { %v662_v47 = vmax.f32 %v622_v43, 0.0 }
 0x202   :  { %v663_v49 = vmax.f32 %v624_v45, 0.0 }
 0x203   :  { %v680_v50 = vpack.c.bf16 %v662_v47, %v660_v46 }
 0x204   :  { %v681_v51 = vpack.c.bf16 %v663_v49, %v661_v48  ;;  %v627_v52 = vpop.f32.mrb[28].mxu1 }
 0x205   :  { %v628_v53 = vadd.f32 %v627_v52, %v2924_v17  ;;  %v629_v54 = vpop.f32.mrb[29].mxu1 }
 0x206   :  { %v630_v55 = vadd.f32 %v629_v54, %v2928_v18  ;;  %v631_v63 = vpop.f32.mrb[30].mxu1  ;;  %899 = vmatprep.mubr.bf16.mxu0 %v681_v51 }
 0x207   :  { %v664_v0 = vmax.f32 %v628_v53, 0.0  ;;  %v632_v56 = vadd.f32 %v631_v63, %v2924_v17  ;;  %v633_v57 = vpop.f32.mrb[31].mxu1  ;;  %900 = vmatmul.mubr.bf16.gmra.mrb[56].mxu0 %v680_v50  ;;  %v1179_v17 = vsel %vm1132_vm2, %v2397_v6, 0 }
 0x208   :  { %v665_v58 = vmax.f32 %v630_v55, 0.0  ;;  %v634_v61 = vadd.f32 %v633_v57, %v2928_v18  ;;  %2261 = vmatpush3.bf16.xpose.msra.mxu1 %v1179_v17 }
 0x209   :  { %v666_v1 = vmax.f32 %v632_v56, 0.0 }
 0x20a   :  { %v667_v2 = vmax.f32 %v634_v61, 0.0 }
 0x20b   :  { %v682_v3 = vpack.c.bf16 %v666_v1, %v664_v0 }
 0x20c   :  { %v683_v4 = vpack.c.bf16 %v667_v2, %v665_v58 }
 0x20e   :  { %907 = vmatprep.mubr.bf16.mxu0 %v683_v4 }
 0x20f   :  { %908 = vmatmul.mubr.bf16.gmra.mrb[60].mxu0 %v682_v3 }
 0x2aa   :  { %v2198_v18 = vpop.f32.mrb[32].mxu0 }
 0x2ab   :  { %v2199_v7 = vpop.f32.mrb[33].mxu0 }
 0x2ac   :  { %v2200_v8 = vadd.f32 %v2199_v7, %v2198_v18  ;;  %v2201_v9 = vpop.f32.mrb[34].mxu0 }
 0x2ad   :  { %v2202_v11 = vpop.f32.mrb[35].mxu0 }
 0x2ae   :  { %v2203_v12 = vadd.f32 %v2202_v11, %v2201_v9  ;;  %v2976_v13 = vadd.f32 %v2200_v8, %v2973_v10 }
 0x2b0   :  { %v2979_v14 = vadd.f32 %v2203_v12, %v2973_v10 }
 0x2b2   :  { %v1012_v15 = vpack.c.bf16 %v2979_v14, %v2976_v13  ;;  %v2204_v16 = vpop.f32.mrb[36].mxu0 }
 0x2b3   :  { %v2205_v19 = vpop.f32.mrb[37].mxu0 }
 0x2b4   :  { %v2206_v20 = vadd.f32 %v2205_v19, %v2204_v16  ;;  %v2207_v21 = vpop.f32.mrb[38].mxu0  ;;  %2262 = vmatprep.mubr.msk.bf16.mxu1 %vm1132_vm2, %v1012_v15 }
 0x2b5   :  { %v2208_v22 = vpop.f32.mrb[39].mxu0  ;;  %2263 = vmatmul.mubr.msk.bf16.vlgmr.msra.gmra.mrb[32].mxu1 %vm1132_vm2, %v1012_v15 }
 0x2b6   :  { %v2209_v23 = vadd.f32 %v2208_v22, %v2207_v21  ;;  %v2986_v24 = vadd.f32 %v2206_v20, %v2973_v10 }
 0x2b8   :  { %v2989_v25 = vadd.f32 %v2209_v23, %v2973_v10 }
 0x2ba   :  { %v1013_v26 = vpack.c.bf16 %v2989_v25, %v2986_v24  ;;  %v2210_v27 = vpop.f32.mrb[40].mxu0 }
 0x2bb   :  { %v2211_v28 = vpop.f32.mrb[41].mxu0 }
 0x2bc   :  { %v2212_v60 = vadd.f32 %v2211_v28, %v2210_v27  ;;  %v2213_v29 = vpop.f32.mrb[42].mxu0  ;;  %2264 = vmatprep.mubr.msk.bf16.mxu1 %vm1132_vm2, %v1013_v26 }
 0x2bd   :  { %v2214_v30 = vpop.f32.mrb[43].mxu0  ;;  %2265 = vmatmul.mubr.msk.bf16.gmra.mrb[36].mxu1 %vm1132_vm2, %v1013_v26 }
 0x2be   :  { %v2215_v59 = vadd.f32 %v2214_v30, %v2213_v29  ;;  %v2996_v62 = vadd.f32 %v2212_v60, %v2973_v10 }
 0x2c0   :  { %v2999_v31 = vadd.f32 %v2215_v59, %v2973_v10 }
 0x2c2   :  { %v1014_v32 = vpack.c.bf16 %v2999_v31, %v2996_v62  ;;  %v2216_v33 = vpop.f32.mrb[44].mxu0 }
 0x2c3   :  { %v2217_v34 = vpop.f32.mrb[45].mxu0 }
 0x2c4   :  { %v2218_v35 = vadd.f32 %v2217_v34, %v2216_v33  ;;  %v2219_v36 = vpop.f32.mrb[46].mxu0  ;;  %2266 = vmatprep.mubr.msk.bf16.mxu1 %vm1132_vm2, %v1014_v32 }
 0x2c5   :  { %v2220_v37 = vpop.f32.mrb[47].mxu0  ;;  %2267 = vmatmul.mubr.msk.bf16.gmra.mrb[40].mxu1 %vm1132_vm2, %v1014_v32 }
 0x2c6   :  { %v2221_v38 = vadd.f32 %v2220_v37, %v2219_v36  ;;  %v3006_v39 = vadd.f32 %v2218_v35, %v2973_v10 }
 0x2c8   :  { %v3009_v40 = vadd.f32 %v2221_v38, %v2973_v10 }
 0x2ca   :  { %v1015_v41 = vpack.c.bf16 %v3009_v40, %v3006_v39  ;;  %v2222_v42 = vpop.f32.mrb[48].mxu0 }
 0x2cb   :  { %v2223_v43 = vpop.f32.mrb[49].mxu0 }
 0x2cc   :  { %v2224_v44 = vadd.f32 %v2223_v43, %v2222_v42  ;;  %v2225_v45 = vpop.f32.mrb[50].mxu0  ;;  %2268 = vmatprep.mubr.msk.bf16.mxu1 %vm1132_vm2, %v1015_v41 }
 0x2cd   :  { %v2226_v46 = vpop.f32.mrb[51].mxu0  ;;  %2269 = vmatmul.mubr.msk.bf16.gmra.mrb[44].mxu1 %vm1132_vm2, %v1015_v41 }
 0x2ce   :  { %v2227_v47 = vadd.f32 %v2226_v46, %v2225_v45  ;;  %v3016_v48 = vadd.f32 %v2224_v44, %v2973_v10 }
 0x2d0   :  { %v3019_v49 = vadd.f32 %v2227_v47, %v2973_v10 }
 0x2d2   :  { %v1016_v50 = vpack.c.bf16 %v3019_v49, %v3016_v48  ;;  %v2228_v51 = vpop.f32.mrb[52].mxu0 }
 0x2d3   :  { %v2229_v52 = vpop.f32.mrb[53].mxu0 }
 0x2d4   :  { %v2230_v53 = vadd.f32 %v2229_v52, %v2228_v51  ;;  %v2231_v54 = vpop.f32.mrb[54].mxu0  ;;  %2270 = vmatprep.mubr.msk.bf16.mxu1 %vm1132_vm2, %v1016_v50 }
 0x2d5   :  { %v2232_v55 = vpop.f32.mrb[55].mxu0  ;;  %2271 = vmatmul.mubr.msk.bf16.gmra.mrb[48].mxu1 %vm1132_vm2, %v1016_v50 }
 0x2d6   :  { %v2233_v63 = vadd.f32 %v2232_v55, %v2231_v54  ;;  %v3026_v0 = vadd.f32 %v2230_v53, %v2973_v10 }
 0x2d8   :  { %v3029_v56 = vadd.f32 %v2233_v63, %v2973_v10 }
 0x2da   :  { %v1017_v57 = vpack.c.bf16 %v3029_v56, %v3026_v0  ;;  %v2234_v58 = vpop.f32.mrb[56].mxu0 }
 0x2db   :  { %v2235_v61 = vpop.f32.mrb[57].mxu0 }
 0x2dc   :  { %v2236_v1 = vadd.f32 %v2235_v61, %v2234_v58  ;;  %v2237_v2 = vpop.f32.mrb[58].mxu0  ;;  %2272 = vmatprep.mubr.msk.bf16.mxu1 %vm1132_vm2, %v1017_v57 }
 0x2dd   :  { %v2238_v3 = vpop.f32.mrb[59].mxu0  ;;  %2273 = vmatmul.mubr.msk.bf16.gmra.mrb[52].mxu1 %vm1132_vm2, %v1017_v57 }
 0x2de   :  { %v2239_v4 = vadd.f32 %v2238_v3, %v2237_v2  ;;  %v3036_v5 = vadd.f32 %v2236_v1, %v2973_v10 }
 0x2e0   :  { %v3039_v6 = vadd.f32 %v2239_v4, %v2973_v10 }
 0x2e2   :  { %v1018_v17 = vpack.c.bf16 %v3039_v6, %v3036_v5  ;;  %v2240_v18 = vpop.f32.mrb[60].mxu0 }
 0x2e3   :  { %v2241_v7 = vpop.f32.mrb[61].mxu0 }
 0x2e4   :  { %v2242_v8 = vadd.f32 %v2241_v7, %v2240_v18  ;;  %v2243_v9 = vpop.f32.mrb[62].mxu0  ;;  %2274 = vmatprep.mubr.msk.bf16.mxu1 %vm1132_vm2, %v1018_v17 }
 0x2e5   :  { %v2244_v11 = vpop.f32.mrb[63].mxu0  ;;  %2275 = vmatmul.mubr.msk.bf16.gmra.mrb[56].mxu1 %vm1132_vm2, %v1018_v17 }
 0x2e6   :  { %v3046_v12 = vadd.f32 %v2242_v8, %v2973_v10  ;;  %v2245_v15 = vadd.f32 %v2244_v11, %v2243_v9 }
 0x2e8   :  { %v3049_v16 = vadd.f32 %v2245_v15, %v2973_v10 }
 0x2ea   :  { %v1019_v19 = vpack.c.bf16 %v3049_v16, %v3046_v12 }
 0x2ec   :  { %2276 = vmatprep.mubr.msk.bf16.mxu1 %vm1132_vm2, %v1019_v19 }
 0x2ed   :  { %2277 = vmatmul.mubr.msk.bf16.gmra.mrb[60].mxu1 %vm1132_vm2, %v1019_v19 }
 0x388   :  { %v3055_v20 = vpop.f32.mrb[32].mxu1 }
 0x389   :  { %v3057_v21 = vpop.f32.mrb[33].mxu1 }
 0x38a   :  { %v3059_v22 = vpop.f32.mrb[34].mxu1  ;;  %v1318_v23 = vmax.f32 %v3055_v20, %v3057_v21 }
 0x38b   :  { %v3063_v26 = vpop.f32.mrb[35].mxu1 }
 0x38c   :  { %1319 = vmax.xlane.f32.xlu0 %v1318_v23  ;;  %v1321_v10 = vmax.f32 %v3059_v22, %v3063_v26 }
 0x390   :  { %1322 = vmax.xlane.f32.xlu0 %v1321_v10  ;;  %v3067_v27 = vpop.f32.mrb[36].mxu1 }
 0x391   :  { %v3069_v28 = vpop.f32.mrb[37].mxu1 }
 0x392   :  { %v3071_v60 = vpop.f32.mrb[38].mxu1  ;;  %v1324_v29 = vmax.f32 %v3067_v27, %v3069_v28 }
 0x393   :  { %v3075_v30 = vpop.f32.mrb[39].mxu1 }
 0x394   :  { %1325 = vmax.xlane.f32.xlu1 %v1324_v29  ;;  %v1327_v59 = vmax.f32 %v3071_v60, %v3075_v30 }
 0x398   :  { %1328 = vmax.xlane.f32.xlu1 %v1327_v59  ;;  %v3079_v32 = vpop.f32.mrb[40].mxu1 }
 0x399   :  { %v3081_v33 = vpop.f32.mrb[41].mxu1 }
 0x39a   :  { %v3083_v34 = vpop.f32.mrb[42].mxu1  ;;  %v1330_v35 = vmax.f32 %v3079_v32, %v3081_v33 }
 0x39b   :  { %v3087_v36 = vpop.f32.mrb[43].mxu1 }
 0x39c   :  { %1331 = vmax.xlane.f32.xlu0 %v1330_v35  ;;  %v1333_v37 = vmax.f32 %v3083_v34, %v3087_v36 }
 0x39e   :  { %1334 = vmax.xlane.f32.xlu1 %v1333_v37 }
 0x3a0   :  { %v3091_v38 = vpop.f32.mrb[44].mxu1 }
 0x3a1   :  { %v3093_v41 = vpop.f32.mrb[45].mxu1 }
 0x3a2   :  { %v3095_v42 = vpop.f32.mrb[46].mxu1  ;;  %v1336_v43 = vmax.f32 %v3091_v38, %v3093_v41 }
 0x3a3   :  { %v3099_v44 = vpop.f32.mrb[47].mxu1 }
 0x3a4   :  { %v1339_v45 = vmax.f32 %v3095_v42, %v3099_v44 }
 0x3a8   :  { %v3103_v46 = vpop.f32.mrb[48].mxu1 }
 0x3a9   :  { %v3105_v47 = vpop.f32.mrb[49].mxu1 }
 0x3aa   :  { %v3107_v50 = vpop.f32.mrb[50].mxu1  ;;  %v1342_v51 = vmax.f32 %v3103_v46, %v3105_v47 }
 0x3ab   :  { %v3111_v52 = vpop.f32.mrb[51].mxu1 }
 0x3ac   :  { %v1345_v53 = vmax.f32 %v3107_v50, %v3111_v52 }
 0x3b0   :  { %v3115_v54 = vpop.f32.mrb[52].mxu1 }
 0x3b1   :  { %v3117_v55 = vpop.f32.mrb[53].mxu1 }
 0x3b2   :  { %v3119_v63 = vpop.f32.mrb[54].mxu1  ;;  %v1348_v57 = vmax.f32 %v3115_v54, %v3117_v55 }
 0x3b3   :  { %v3123_v58 = vpop.f32.mrb[55].mxu1 }
 0x3b4   :  { %1349 = vmax.xlane.f32.xlu0 %v1348_v57  ;;  %v1351_v61 = vmax.f32 %v3119_v63, %v3123_v58 }
 0x3b6   :  { %1352 = vmax.xlane.f32.xlu1 %v1351_v61 }
 0x3b8   :  { %1337 = vmax.xlane.f32.xlu0 %v1336_v43  ;;  %v3127_v1 = vpop.f32.mrb[56].mxu1 }
 0x3b9   :  { %v3129_v2 = vpop.f32.mrb[57].mxu1 }
 0x3ba   :  { %1340 = vmax.xlane.f32.xlu1 %v1339_v45  ;;  %v3131_v3 = vpop.f32.mrb[58].mxu1  ;;  %v1354_v4 = vmax.f32 %v3127_v1, %v3129_v2 }
 0x3bb   :  { %v3135_v17 = vpop.f32.mrb[59].mxu1 }
 0x3bc   :  { %1355 = vmax.xlane.f32.xlu0 %v1354_v4  ;;  %v1357_v18 = vmax.f32 %v3131_v3, %v3135_v17 }
 0x3be   :  { %1358 = vmax.xlane.f32.xlu1 %v1357_v18 }
 0x3c0   :  { %1343 = vmax.xlane.f32.xlu0 %v1342_v51  ;;  %v3139_v7 = vpop.f32.mrb[60].mxu1 }
 0x3c1   :  { %v3141_v8 = vpop.f32.mrb[61].mxu1 }
 0x3c2   :  { %1346 = vmax.xlane.f32.xlu1 %v1345_v53  ;;  %v3143_v9 = vpop.f32.mrb[62].mxu1  ;;  %v1360_v11 = vmax.f32 %v3139_v7, %v3141_v8 }
 0x3c3   :  { %v3147_v15 = vpop.f32.mrb[63].mxu1 }
 0x3c4   :  { %1361 = vmax.xlane.f32.xlu0 %v1360_v11  ;;  %v1363_v19 = vmax.f32 %v3143_v9, %v3147_v15 }
 0x3c6   :  { %1364 = vmax.xlane.f32.xlu1 %v1363_v19 }
 0x419   :  { %v1320_v23 = vpop.xlane.xlu0 %1319 }
 0x41a   :  { %v1366_v10 = vsub.f32 %v3055_v20, %v1320_v23  ;;  %v1367_v29 = vsub.f32 %v3057_v21, %v1320_v23 }
 0x41c   :  { %v1398_v59 = vmul.f32 1.442695, %v1366_v10  ;;  %v1400_v35 = vmul.f32 1.442695, %v1367_v29 }
 0x41d   :  { %v1323_v37 = vpop.xlane.xlu0 %1322 }
 0x41e   :  { %2446 = vpow2.f32 %v1398_v59  ;;  %v1368_v43 = vsub.f32 %v3059_v22, %v1323_v37  ;;  %v1369_v45 = vsub.f32 %v3063_v26, %v1323_v37 }
 0x41f   :  { %2448 = vpow2.f32 %v1400_v35 }
 0x420   :  { %v1402_v51 = vmul.f32 1.442695, %v1368_v43  ;;  %v1404_v53 = vmul.f32 1.442695, %v1369_v45 }
 0x421   :  { %v1326_v57 = vpop.xlane.xlu1 %1325 }
 0x422   :  { %2450 = vpow2.f32 %v1402_v51  ;;  %v1370_v61 = vsub.f32 %v3067_v27, %v1326_v57  ;;  %v1371_v4 = vsub.f32 %v3069_v28, %v1326_v57 }
 0x423   :  { %2452 = vpow2.f32 %v1404_v53 }
 0x424   :  { %v1406_v20 = vmul.f32 1.442695, %v1370_v61  ;;  %v1408_v21 = vmul.f32 1.442695, %v1371_v4 }
 0x425   :  { %v1329_v18 = vpop.xlane.xlu1 %1328 }
 0x426   :  { %2454 = vpow2.f32 %v1406_v20  ;;  %v1372_v11 = vsub.f32 %v3071_v60, %v1329_v18  ;;  %v1373_v22 = vsub.f32 %v3075_v30, %v1329_v18 }
 0x427   :  { %2456 = vpow2.f32 %v1408_v21 }
 0x428   :  { %v3159_v26 = vpop.eup %2446  ;;  %v1410_v19 = vmul.f32 1.442695, %v1372_v11  ;;  %v1412_v23 = vmul.f32 1.442695, %v1373_v22 }
 0x429   :  { %v3161_v10 = vpop.eup %2448  ;;  %v1332_v29 = vpop.xlane.xlu0 %1331 }
 0x42a   :  { %2458 = vpow2.f32 %v1410_v19  ;;  %v1374_v27 = vsub.f32 %v3079_v32, %v1332_v29  ;;  %v1375_v28 = vsub.f32 %v3081_v33, %v1332_v29  ;;  %v1462_v59 = vadd.f32 %v3161_v10, %v3159_v26 }
 0x42b   :  { %2460 = vpow2.f32 %v1412_v23  ;;  %v1335_v60 = vpop.xlane.xlu1 %1334 }
 0x42c   :  { %v3167_v35 = vpop.eup %2450  ;;  %v1414_v30 = vmul.f32 1.442695, %v1374_v27  ;;  %v1416_v37 = vmul.f32 1.442695, %v1375_v28  ;;  %v1376_v43 = vsub.f32 %v3083_v34, %v1335_v60  ;;  %v1377_v45 = vsub.f32 %v3087_v36, %v1335_v60  ;;  %1463 = vadd.xlane.f32.xlu0 %v1462_v59 }
 0x42d   :  { %v3171_v51 = vpop.eup %2452 }
 0x42e   :  { %2462 = vpow2.f32 %v1414_v30  ;;  %v1418_v32 = vmul.f32 1.442695, %v1376_v43  ;;  %v1420_v53 = vmul.f32 1.442695, %v1377_v45  ;;  %v1465_v33 = vadd.f32 %v3171_v51, %v3167_v35 }
 0x42f   :  { %2464 = vpow2.f32 %v1416_v37 }
 0x430   :  { %v3175_v57 = vpop.eup %2454  ;;  %2466 = vpow2.f32 %v1418_v32  ;;  %1466 = vadd.xlane.f32.xlu1 %v1465_v33 }
 0x431   :  { %v3177_v61 = vpop.eup %2456  ;;  %2468 = vpow2.f32 %v1420_v53  ;;  %v2658_v53 = vmov 32  }
 0x432   :  { %v1468_v34 = vadd.f32 %v3177_v61, %v3175_v57  ;;  %2308 = vset.pattern.permute.xlu0 %v2658_v53  ;;  %2309 = vset.pattern.permute.xlu1 %v2658_v53 }
 0x434   :  { %v3181_v36 = vpop.eup %2458  ;;  %1469 = vadd.xlane.f32.xlu0 %v1468_v34 }
 0x435   :  { %v3183_v4 = vpop.eup %2460 }
 0x436   :  { %v1471_v20 = vadd.f32 %v3183_v4, %v3181_v36 }
 0x438   :  { %v3187_v21 = vpop.eup %2462  ;;  %1472 = vadd.xlane.f32.xlu1 %v1471_v20 }
 0x439   :  { %v3189_v18 = vpop.eup %2464 }
 0x43a   :  { %v3191_v11 = vpop.eup %2466  ;;  %v1474_v22 = vadd.f32 %v3189_v18, %v3187_v21 }
 0x43b   :  { %v3195_v19 = vpop.eup %2468 }
 0x43c   :  { %1475 = vadd.xlane.f32.xlu0 %v1474_v22  ;;  %v1477_v23 = vadd.f32 %v3195_v19, %v3191_v11 }
 0x43e   :  { %1478 = vadd.xlane.f32.xlu1 %v1477_v23 }
 0x441   :  { %v1350_v29 = vpop.xlane.xlu0 %1349 }
 0x442   :  { %v1386_v60 = vsub.f32 %v3115_v54, %v1350_v29  ;;  %v1387_v33 = vsub.f32 %v3117_v55, %v1350_v29 }
 0x443   :  { %v1353_v27 = vpop.xlane.xlu1 %1352 }
 0x444   :  { %v1438_v23 = vmul.f32 1.442695, %v1386_v60 }
 0x445   :  { %v1338_v28 = vpop.xlane.xlu0 %1337 }
 0x446   :  { %v1378_v59 = vsub.f32 %v3091_v38, %v1338_v28  ;;  %v1379_v30 = vsub.f32 %v3093_v41, %v1338_v28  ;;  %v1440_v41 = vmul.f32 1.442695, %v1387_v33  ;;  %v1388_v28 = vsub.f32 %v3119_v63, %v1353_v27 }
 0x447   :  { %v1341_v37 = vpop.xlane.xlu1 %1340 }
 0x448   :  { %v1422_v43 = vmul.f32 1.442695, %v1378_v59  ;;  %v1380_v45 = vsub.f32 %v3095_v42, %v1341_v37  ;;  %v1381_v32 = vsub.f32 %v3099_v44, %v1341_v37  ;;  %v1424_v34 = vmul.f32 1.442695, %v1379_v30 }
 0x449   :  { %v1356_v20 = vpop.xlane.xlu0 %1355  ;;  %v1389_v59 = vsub.f32 %v3123_v58, %v1353_v27 }
 0x44a   :  { %2470 = vpow2.f32 %v1422_v43  ;;  %v1426_v22 = vmul.f32 1.442695, %v1380_v45  ;;  %v1428_v38 = vmul.f32 1.442695, %v1381_v32  ;;  %v1390_v30 = vsub.f32 %v3127_v1, %v1356_v20 }
 0x44b   :  { %2472 = vpow2.f32 %v1424_v34  ;;  %v1359_v54 = vpop.xlane.xlu1 %1358  ;;  %v1442_v45 = vmul.f32 1.442695, %v1388_v28  ;;  %v1391_v63 = vsub.f32 %v3129_v2, %v1356_v20 }
 0x44c   :  { %2474 = vpow2.f32 %v1426_v22  ;;  %v1393_v33 = vsub.f32 %v3135_v17, %v1359_v54 }
 0x44d   :  { %2476 = vpow2.f32 %v1428_v38  ;;  %v1344_v42 = vpop.xlane.xlu0 %1343  ;;  %v1448_v2 = vmul.f32 1.442695, %v1391_v63 }
 0x44e   :  { %v1382_v44 = vsub.f32 %v3103_v46, %v1344_v42  ;;  %2478 = vpow2.f32 %v1438_v23  ;;  %v1383_v55 = vsub.f32 %v3105_v47, %v1344_v42  ;;  %v1392_v46 = vsub.f32 %v3131_v3, %v1359_v54 }
 0x44f   :  { %v1347_v29 = vpop.xlane.xlu1 %1346  ;;  %2480 = vpow2.f32 %v1440_v41  ;;  %v1444_v47 = vmul.f32 1.442695, %v1389_v59  ;;  %v1452_v41 = vmul.f32 1.442695, %v1393_v33 }
 0x450   :  { %v1430_v37 = vmul.f32 1.442695, %v1382_v44  ;;  %v1384_v60 = vsub.f32 %v3107_v50, %v1347_v29  ;;  %v1385_v43 = vsub.f32 %v3111_v52, %v1347_v29  ;;  %v1432_v32 = vmul.f32 1.442695, %v1383_v55 }
 0x451   :  { %v1362_v53 = vpop.xlane.xlu0 %1361  ;;  %v1446_v50 = vmul.f32 1.442695, %v1390_v30  ;;  %v1450_v38 = vmul.f32 1.442695, %v1392_v46 }
 0x452   :  { %2482 = vpow2.f32 %v1430_v37  ;;  %v1434_v58 = vmul.f32 1.442695, %v1384_v60  ;;  %v1436_v27 = vmul.f32 1.442695, %v1385_v43  ;;  %v1394_v52 = vsub.f32 %v3139_v7, %v1362_v53 }
 0x453   :  { %2484 = vpow2.f32 %v1432_v32  ;;  %v1365_v1 = vpop.xlane.xlu1 %1364  ;;  %v1395_v3 = vsub.f32 %v3141_v8, %v1362_v53 }
 0x454   :  { %v3215_v34 = vpop.eup %2470  ;;  %2486 = vpow2.f32 %v1434_v58  ;;  %v1396_v17 = vsub.f32 %v3143_v9, %v1365_v1  ;;  %v1397_v7 = vsub.f32 %v3147_v15, %v1365_v1  ;;  %v1454_v28 = vmul.f32 1.442695, %v1394_v52 }
 0x455   :  { %v3218_v22 = vpop.eup %2472  ;;  %2488 = vpow2.f32 %v1436_v27  ;;  %v1456_v44 = vmul.f32 1.442695, %v1395_v3 }
 0x456   :  { %v3221_v20 = vpop.eup %2474  ;;  %2490 = vpow2.f32 %v1442_v45  ;;  %v1480_v23 = vadd.f32 %v3218_v22, %v3215_v34  ;;  %v1458_v9 = vmul.f32 1.442695, %v1396_v17  ;;  %v1460_v55 = vmul.f32 1.442695, %v1397_v7  ;;  %v2403_v7 = vld [vmem:[%s3500_s2 + $0x14] ss:$8 sps:$4 sm:$0xff]  }
 0x457   :  { %v3226_v54 = vpop.eup %2476  ;;  %2492 = vpow2.f32 %v1444_v47 }
 0x458   :  { %2494 = vpow2.f32 %v1446_v50  ;;  %1481 = vadd.xlane.f32.xlu0 %v1480_v23  ;;  %v1483_v8 = vadd.f32 %v3226_v54, %v3221_v20  ;;  %v3231_v42 = vpop.eup %2478  ;;  %v2398_v23 = vld [vmem:[%s3500_s2] ss:$8 sps:$4 sm:$0xff]  }
 0x459   :  { %2496 = vpow2.f32 %v1448_v2  ;;  %v3233_v59 = vpop.eup %2480 }
 0x45a   :  { %2498 = vpow2.f32 %v1450_v38  ;;  %1484 = vadd.xlane.f32.xlu1 %v1483_v8  ;;  %v1492_v53 = vadd.f32 %v3233_v59, %v3231_v42  ;;  %v2406_v8 = vld [vmem:[%s3500_s2 + $0x24] ss:$8 sps:$4 sm:$0xff]  }
 0x45b   :  { %2500 = vpow2.f32 %v1452_v41  ;;  %v2400_v41 = vld [vmem:[%s3500_s2 + $0x4] ss:$8 sps:$4 sm:$0xff]  }
 0x45c   :  { %v3235_v29 = vpop.eup %2482  ;;  %2502 = vpow2.f32 %v1454_v28  ;;  %1766 = vmatprep.subr.bf16.mxu0 %v2400_v41  ;;  %v2401_v28 = vld [vmem:[%s3500_s2 + $0x10] ss:$8 sps:$4 sm:$0xff]   ;;  %v2418_v41 = vld [vmem:[%s3500_s2 + $0x64] ss:$8 sps:$4 sm:$0xff]  }
 0x45d   :  { %v3237_v15 = vpop.eup %2484  ;;  %2504 = vpow2.f32 %v1456_v44  ;;  %1767 = vmatpush1.bf16.xpose.msra.mxu0 %v2398_v23  ;;  %v2404_v44 = vld [vmem:[%s3500_s2 + $0x20] ss:$8 sps:$4 sm:$0xff]  }
 0x45e   :  { %v3239_v30 = vpop.eup %2486  ;;  %2506 = vpow2.f32 %v1458_v9  ;;  %v1486_v37 = vadd.f32 %v3237_v15, %v3235_v29  ;;  %1768 = vmatprep.subr.bf16.mxu0 %v2403_v7  ;;  %v2409_v9 = vld [vmem:[%s3500_s2 + $0x34] ss:$8 sps:$4 sm:$0xff]  }
 0x45f   :  { %v3243_v60 = vpop.eup %2488  ;;  %2508 = vpow2.f32 %v1460_v55  ;;  %v2094_v55 = vmul.f32 -1.442695, %v2976_v13  ;;  %v2410_v13 = vld [vmem:[%s3500_s2 + $0x40] ss:$8 sps:$4 sm:$0xff]  }
 0x460   :  { %v3245_v43 = vpop.eup %2490  ;;  %1487 = vadd.xlane.f32.xlu0 %v1486_v37  ;;  %v1489_v45 = vadd.f32 %v3243_v60, %v3239_v30  ;;  %v2407_v37 = vld [vmem:[%s3500_s2 + $0x30] ss:$8 sps:$4 sm:$0xff]  }
 0x461   :  { %v3249_v63 = vpop.eup %2492  ;;  %2510 = vpow2.f32 %v2094_v55  ;;  %v2416_v55 = vld [vmem:[%s3500_s2 + $0x60] ss:$8 sps:$4 sm:$0xff]  }
 0x462   :  { %v3251_v32 = vpop.eup %2494  ;;  %1490 = vadd.xlane.f32.xlu1 %v1489_v45  ;;  %v1495_v27 = vadd.f32 %v3249_v63, %v3245_v43  ;;  %v2095_v45 = vmul.f32 -1.442695, %v2979_v14  ;;  %v2097_v14 = vmul.f32 -1.442695, %v2989_v25  ;;  %v2099_v25 = vmul.f32 -1.442695, %v2999_v31 }
 0x463   :  { %v3255_v46 = vpop.eup %2496 }
 0x464   :  { %v3257_v58 = vpop.eup %2498  ;;  %1493 = vadd.xlane.f32.xlu0 %v1492_v53  ;;  %v1498_v1 = vadd.f32 %v3255_v46, %v3251_v32  ;;  %v2412_v53 = vld [vmem:[%s3500_s2 + $0x44] ss:$8 sps:$4 sm:$0xff]   ;;  %2512 = vpow2.f32 %v2095_v45 }
 0x465   :  { %v3261_v47 = vpop.eup %2500  ;;  %1769 = vmatpush1.bf16.xpose.msra.mxu0 %v2401_v28 }
 0x466   :  { %v3263_v33 = vpop.eup %2502  ;;  %1496 = vadd.xlane.f32.xlu1 %v1495_v27  ;;  %v1501_v2 = vadd.f32 %v3261_v47, %v3257_v58  ;;  %1770 = vmatprep.subr.bf16.mxu0 %v2406_v8  ;;  %v2096_v27 = vmul.f32 -1.442695, %v2986_v24  ;;  %v2413_v24 = vld [vmem:[%s3500_s2 + $0x50] ss:$8 sps:$4 sm:$0xff]  }
 0x467   :  { %3511 = vst [vmem:[#allocation8_spill] sm:$0xff] %v3263_v33  ;;  %v3267_v50 = vpop.eup %2504 }
 0x468   :  { %3512 = vst [vmem:[#allocation9_spill] sm:$0xff] %v3267_v50  ;;  %v3269_v52 = vpop.eup %2506  ;;  %1499 = vadd.xlane.f32.xlu0 %v1498_v1  ;;  %v1504_v38 = vadd.f32 %v3267_v50, %v3263_v33  ;;  %v2415_v1 = vld [vmem:[%s3500_s2 + $0x54] ss:$8 sps:$4 sm:$0xff]   ;;  %2514 = vpow2.f32 %v2096_v27 }
 0x469   :  { %v3273_v3 = vpop.eup %2508  ;;  %2516 = vpow2.f32 %v2097_v14 }
 0x46a   :  { %3513 = vst [vmem:[#allocation10_spill] sm:$0xff] %v3273_v3  ;;  %1502 = vadd.xlane.f32.xlu1 %v1501_v2  ;;  %v1507_v17 = vadd.f32 %v3273_v3, %v3269_v52 }
 0x46b   :  { %v2511_v2 = vpop.eup %2510 }
 0x46c   :  { %1505 = vadd.xlane.f32.xlu0 %v1504_v38  ;;  %v2098_v38 = vmul.f32 -1.442695, %v2996_v62  ;;  %v964_v23 = vadd.f32 1.0, %v2511_v2 }
 0x46d   :  { %1771 = vmatpush1.bf16.xpose.msra.mxu0 %v2404_v44 }
 0x46e   :  { %1508 = vadd.xlane.f32.xlu1 %v1507_v17  ;;  %1772 = vmatprep.subr.bf16.mxu0 %v2409_v9  ;;  %v2513_v17 = vpop.eup %2512  ;;  %2518 = vpow2.f32 %v2098_v38 }
 0x46f   :  { %v965_v7 = vadd.f32 1.0, %v2513_v17  ;;  %2520 = vrcp.f32 %v964_v23  ;;  %v3330_v17 = vld [vmem:[%s3500_s2 + $0x80] ss:$8 sps:$4 sm:$0xff]   ;;  %v2421_v23 = vld [vmem:[%s3500_s2 + $0x84] ss:$8 sps:$4 sm:$0xff]  }
 0x470   :  { %2278 = vmatprep.subr.bf16.mxu1 %v2421_v23 }
 0x471   :  { %2286 = vmatpush1.bf16.xpose.msra.mxu1 %v3330_v17 }
 0x472   :  { %v2515_v8 = vpop.eup %2514 }
 0x473   :  { %v966_v62 = vadd.f32 1.0, %v2515_v8  ;;  %v2517_v9 = vpop.eup %2516 }
 0x475   :  { %1773 = vmatpush1.bf16.xpose.msra.mxu0 %v2407_v37  ;;  %v967_v37 = vadd.f32 1.0, %v2517_v9 }
 0x476   :  { %1774 = vmatprep.subr.bf16.mxu0 %v2412_v53 }
 0x478   :  { %v2519_v53 = vpop.eup %2518 }
 0x479   :  { %v2521_v31 = vpop.eup %2520 }
 0x47d   :  { %1775 = vmatpush1.bf16.xpose.msra.mxu0 %v2410_v13  ;;  %v968_v13 = vadd.f32 1.0, %v2519_v53  ;;  %v3350_v53 = vld [vmem:[%s3500_s2 + $0x94] ss:$8 sps:$4 sm:$0xff]  }
 0x47e   :  { %1776 = vmatprep.subr.bf16.mxu0 %v2415_v1  ;;  %2279 = vmatprep.subr.bf16.mxu1 %v3350_v53 }
 0x485   :  { %1777 = vmatpush1.bf16.xpose.msra.mxu0 %v2413_v24  ;;  %v2422_v24 = vld [vmem:[%s3500_s2 + $0x70] ss:$8 sps:$4 sm:$0xff]  }
 0x486   :  { %1778 = vmatprep.subr.bf16.mxu0 %v2418_v41 }
 0x48d   :  { %1779 = vmatpush1.bf16.xpose.msra.mxu0 %v2416_v55 }
 0x4b9   :  { %v1464_v28 = vpop.xlane.xlu0 %1463 }
 0x4ba   :  { %2522 = vrcp.f32 %v1464_v28 }
 0x4bb   :  { %2524 = vrcp.f32 %v965_v7  ;;  %v2424_v7 = vld [vmem:[%s3500_s2 + $0x74] ss:$8 sps:$4 sm:$0xff]  }
 0x4bc   :  { %2526 = vpow2.f32 %v2099_v25  ;;  %1780 = vmatprep.subr.bf16.mxu0 %v2424_v7  ;;  %v2104_v7 = vmul.f32 -1.442695, %v3026_v0  ;;  %v3384_v0 = vld [vmem:[%s3500_s2 + $0xc4] ss:$8 sps:$4 sm:$0xff]  }
 0x4bd   :  { %v1467_v44 = vpop.xlane.xlu1 %1466  ;;  %1781 = vmatpush1.bf16.xpose.msra.mxu0 %v2422_v24  ;;  %v3363_v24 = vld [vmem:[%s3500_s2 + $0xa4] ss:$8 sps:$4 sm:$0xff]  }
 0x4be   :  { %2528 = vrcp.f32 %v1467_v44  ;;  %1936 = vmatprep.subr.bf16.mxu0 %v2421_v23  ;;  %v3358_v23 = vld [vmem:[%s3500_s2 + $0xa0] ss:$8 sps:$4 sm:$0xff]  }
 0x4bf   :  { %2530 = vrcp.f32 %v966_v62 }
 0x4c1   :  { %v1470_v45 = vpop.xlane.xlu0 %1469 }
 0x4c2   :  { %2532 = vrcp.f32 %v1470_v45  ;;  %v3345_v45 = vld [vmem:[%s3500_s2 + $0x90] ss:$8 sps:$4 sm:$0xff]  }
 0x4c3   :  { %2534 = vrcp.f32 %v967_v37  ;;  %2287 = vmatpush1.bf16.xpose.msra.mxu1 %v3345_v45 }
 0x4c4   :  { %v2523_v27 = vpop.eup %2522  ;;  %2280 = vmatprep.subr.bf16.mxu1 %v3363_v24 }
 0x4c5   :  { %v1473_v1 = vpop.xlane.xlu1 %1472  ;;  %v1526_v14 = vmul.f32 %v2523_v27, %v2521_v31  ;;  %v2525_v2 = vpop.eup %2524 }
 0x4c6   :  { %2536 = vrcp.f32 %v1473_v1  ;;  %v2527_v38 = vpop.eup %2526 }
 0x4c7   :  { %1544 = vperm.xlu0 %2308, %v1526_v14   ;;  %2538 = vrcp.f32 %v968_v13  ;;  %v969_v8 = vadd.f32 1.0, %v2527_v38  ;;  %v2101_v13 = vmul.f32 -1.442695, %v3009_v40 }
 0x4c8   :  { %v2529_v41 = vpop.eup %2528 }
 0x4c9   :  { %v1476_v25 = vpop.xlane.xlu0 %1475  ;;  %v1527_v28 = vmul.f32 %v2529_v41, %v2525_v2  ;;  %v2531_v62 = vpop.eup %2530 }
 0x4ca   :  { %2540 = vrcp.f32 %v1476_v25  ;;  %v2105_v25 = vmul.f32 -1.442695, %v3029_v56  ;;  %v2100_v56 = vmul.f32 -1.442695, %v3006_v39 }
 0x4cb   :  { %1549 = vperm.xlu1 %2309, %v1527_v28   ;;  %v1479_v44 = vpop.xlane.xlu1 %1478  ;;  %2288 = vmatpush1.bf16.xpose.msra.mxu1 %v3358_v23  ;;  %v3372_v28 = vld [vmem:[%s3500_s2 + $0xb0] ss:$8 sps:$4 sm:$0xff]  }
 0x4cc   :  { %v2533_v9 = vpop.eup %2532  ;;  %2542 = vrcp.f32 %v1479_v44  ;;  %v2107_v44 = vmul.f32 -1.442695, %v3039_v6  ;;  %v3393_v6 = vld [vmem:[%s3500_s2 + $0xc0] ss:$8 sps:$4 sm:$0xff]  }
 0x4cd   :  { %v1528_v55 = vmul.f32 %v2533_v9, %v2531_v62  ;;  %2544 = vrcp.f32 %v969_v8  ;;  %v2535_v37 = vpop.eup %2534  ;;  %v3377_v8 = vld [vmem:[%s3500_s2 + $0xb4] ss:$8 sps:$4 sm:$0xff]  }
 0x4ce   :  { %2546 = vpow2.f32 %v2101_v13  ;;  %2281 = vmatprep.subr.bf16.mxu1 %v3377_v8 }
 0x4cf   :  { %1554 = vperm.xlu1 %2309, %v1528_v55   ;;  %2548 = vpow2.f32 %v2104_v7  ;;  %v2103_v55 = vmul.f32 -1.442695, %v3019_v49  ;;  %v2109_v49 = vmul.f32 -1.442695, %v3049_v16 }
 0x4d0   :  { %v2537_v31 = vpop.eup %2536  ;;  %2550 = vpow2.f32 %v2105_v25 }
 0x4d1   :  { %v1529_v27 = vmul.f32 %v2537_v31, %v2535_v37  ;;  %v2539_v1 = vpop.eup %2538  ;;  %2552 = vpow2.f32 %v2107_v44  ;;  %v2106_v31 = vmul.f32 -1.442695, %v3036_v5 }
 0x4d2   :  { %2554 = vpow2.f32 %v2100_v56 }
 0x4d3   :  { %1559 = vperm.xlu1 %2309, %v1529_v27   ;;  %2289 = vmatpush1.bf16.xpose.msra.mxu1 %v3372_v28  ;;  %v3399_v27 = vld [vmem:[%s3500_s2 + $0xd4] ss:$8 sps:$4 sm:$0xff]  }
 0x4d4   :  { %v2541_v14 = vpop.eup %2540  ;;  %2282 = vmatprep.subr.bf16.mxu1 %v3384_v0 }
 0x4d5   :  { %v1530_v2 = vmul.f32 %v2541_v14, %v2539_v1  ;;  %v2102_v14 = vmul.f32 -1.442695, %v3016_v48 }
 0x4d6   :  { %v2543_v38 = vpop.eup %2542 }
 0x4d7   :  { %1564 = vperm.xlu1 %2309, %v1530_v2   ;;  %v2545_v40 = vpop.eup %2544 }
 0x4d8   :  { %v1531_v41 = vmul.f32 %v2545_v40, %v2543_v38  ;;  %v2547_v62 = vpop.eup %2546  ;;  %v3408_v38 = vld [vmem:[%s3500_s2 + $0xd0] ss:$8 sps:$4 sm:$0xff]  }
 0x4d9   :  { %v971_v9 = vadd.f32 1.0, %v2547_v62  ;;  %v2549_v13 = vpop.eup %2548  ;;  %v2108_v62 = vmul.f32 -1.442695, %v3046_v12 }
 0x4da   :  { %v2551_v1 = vpop.eup %2550  ;;  %v974_v5 = vadd.f32 1.0, %v2549_v13  ;;  %v3415_v13 = vld [vmem:[%s3500_s2 + $0xe4] ss:$8 sps:$4 sm:$0xff]  }
 0x4db   :  { %1569 = vperm.xlu1 %2309, %v1531_v41   ;;  %2556 = vrcp.f32 %v971_v9  ;;  %2290 = vmatpush1.bf16.xpose.msra.mxu1 %v3393_v6  ;;  %v2553_v40 = vpop.eup %2552  ;;  %v975_v41 = vadd.f32 1.0, %v2551_v1 }
 0x4dc   :  { %2283 = vmatprep.subr.bf16.mxu1 %v3399_v27  ;;  %v2555_v16 = vpop.eup %2554  ;;  %v977_v56 = vadd.f32 1.0, %v2553_v40 }
 0x4e3   :  { %2291 = vmatpush1.bf16.xpose.msra.mxu1 %v3408_v38 }
 0x4e4   :  { %2284 = vmatprep.subr.bf16.mxu1 %v3415_v13 }
 0x4e5   :  { %v1482_v39 = vpop.xlane.xlu0 %1481  ;;  %v2557_v25 = vpop.eup %2556 }
 0x4e7   :  { %v1485_v37 = vpop.xlane.xlu1 %1484 }
 0x4e8   :  { %2558 = vrcp.f32 %v1485_v37 }
 0x4e9   :  { %2560 = vpow2.f32 %v2103_v55 }
 0x4ea   :  { %2562 = vpow2.f32 %v2106_v31  ;;  %v970_v31 = vadd.f32 1.0, %v2555_v16 }
 0x4eb   :  { %2564 = vpow2.f32 %v2109_v49  ;;  %v3420_v49 = vld [vmem:[%s3500_s2 + $0xe0] ss:$8 sps:$4 sm:$0xff]  }
 0x4ec   :  { %2566 = vpow2.f32 %v2102_v14  ;;  %2292 = vmatpush1.bf16.xpose.msra.mxu1 %v3420_v49 }
 0x4ed   :  { %v1488_v2 = vpop.xlane.xlu0 %1487  ;;  %2568 = vrcp.f32 %v974_v5 }
 0x4ef   :  { %v1491_v7 = vpop.xlane.xlu1 %1490 }
 0x4f1   :  { %v1494_v44 = vpop.xlane.xlu0 %1493 }
 0x4f2   :  { %v2559_v48 = vpop.eup %2558  ;;  %2570 = vrcp.f32 %v1494_v44 }
 0x4f3   :  { %2572 = vrcp.f32 %v975_v41  ;;  %v1497_v9 = vpop.xlane.xlu1 %1496  ;;  %v1533_v55 = vmul.f32 %v2559_v48, %v2557_v25  ;;  %v2561_v37 = vpop.eup %2560 }
 0x4f4   :  { %2574 = vrcp.f32 %v1497_v9  ;;  %v2563_v12 = vpop.eup %2562  ;;  %v973_v1 = vadd.f32 1.0, %v2561_v37 }
 0x4f5   :  { %2576 = vpow2.f32 %v2108_v62  ;;  %1579 = vperm.xlu0 %2308, %v1533_v55   ;;  %v2565_v5 = vpop.eup %2564  ;;  %v976_v40 = vadd.f32 1.0, %v2563_v12  ;;  %v1500_v41 = vpop.xlane.xlu0 %1499 }
 0x4f6   :  { %2578 = vrcp.f32 %v977_v56  ;;  %v2567_v16 = vpop.eup %2566  ;;  %v979_v62 = vadd.f32 1.0, %v2565_v5 }
 0x4f7   :  { %2580 = vrcp.f32 %v1482_v39  ;;  %v1503_v14 = vpop.xlane.xlu1 %1502  ;;  %v2569_v25 = vpop.eup %2568  ;;  %v972_v55 = vadd.f32 1.0, %v2567_v16 }
 0x4f8   :  { %2582 = vrcp.f32 %v1503_v14 }
 0x4f9   :  { %2584 = vrcp.f32 %v970_v31  ;;  %v3432_v31 = vld [vmem:[%s3500_s2 + $0xf4] ss:$8 sps:$4 sm:$0xff]   ;;  %v1506_v14 = vpop.xlane.xlu0 %1505 }
 0x4fa   :  { %2586 = vrcp.f32 %v1491_v7  ;;  %v3427_v7 = vld [vmem:[%s3500_s2 + $0xf0] ss:$8 sps:$4 sm:$0xff]   ;;  %2285 = vmatprep.subr.bf16.mxu1 %v3432_v31  ;;  %s2659_s2 = smov [#allocation5]  }
 0x4fb   :  { %2588 = vrcp.f32 %v973_v1  ;;  %v1509_v44 = vpop.xlane.xlu1 %1508  ;;  %2293 = vmatpush1.bf16.xpose.msra.mxu1 %v3427_v7  ;;  %s2015_s26 = sshll.u32 %s2659_s2, 4  ;;  %s2016_s26 = int_to_ptr.vmem [resolvable:$true] %s2015_s26 }
 0x4fc   :  { %v2571_v48 = vpop.eup %2570  ;;  %2590 = vrcp.f32 %v1500_v41  ;;  %s2628_s4 = scalar_lea.vmem %s2016_s26, 2048  ;;  %p2633_p9 = scmp.lt.s32.totalorder %s2016_s26, %s2016_s26 }
 0x4fd   :  { %v2573_v56 = vpop.eup %2572  ;;  %2592 = vrcp.f32 %v976_v40  ;;  %v1536_v39 = vmul.f32 %v2571_v48, %v2569_v25  ;;  %p2629_p8 = scmp.ne.s32.totalorder %s2016_s26, %s2628_s4  ;;  %p2634_p10 = scmp.lt.s32.totalorder %s2628_s4, %s2628_s4 }
 0x4fe   :  { %v2575_v9 = vpop.eup %2574  ;;  %2594 = vrcp.f32 %v1509_v44 }
 0x4ff   :  { %v2577_v37 = vpop.eup %2576  ;;  %2596 = vrcp.f32 %v979_v62  ;;  %1594 = vperm.xlu1 %2309, %v1536_v39   ;;  %v1537_v5 = vmul.f32 %v2575_v9, %v2573_v56  ;;  %p2635_p11 = por %p2634_p10, %p2633_p9 }
 0x500   :  { %v2579_v12 = vpop.eup %2578  ;;  %2598 = vrcp.f32 %v1488_v2  ;;  %v978_v41 = vadd.f32 1.0, %v2577_v37 }
 0x501   :  { %v2581_v1 = vpop.eup %2580  ;;  %2600 = vrcp.f32 %v972_v55  ;;  %p2636_p12 = pnand %p2635_p11, %p2629_p8 }
 0x502   :  { %v2583_v40 = vpop.eup %2582  ;;  %2602 = vrcp.f32 %v1506_v14 }
 0x503   :  { %v2585_v16 = vpop.eup %2584  ;;  %1599 = vperm.xlu1 %2309, %v1537_v5   ;;  %v1539_v25 = vmul.f32 %v2583_v40, %v2579_v12  ;;  %2604 = vrcp.f32 %v978_v41 }
 0x504   :  { %v2587_v62 = vpop.eup %2586  ;;  %v1532_v48 = vmul.f32 %v2585_v16, %v2581_v1 }
 0x505   :  { %v2589_v44 = vpop.eup %2588  ;;  %1609 = vperm.xlu0 %2308, %v1539_v25  }
 0x506   :  { %v2591_v39 = vpop.eup %2590  ;;  %v1535_v56 = vmul.f32 %v2589_v44, %v2587_v62 }
 0x507   :  { %v2593_v2 = vpop.eup %2592  ;;  %1574 = vperm.xlu1 %2309, %v1532_v48  }
 0x508   :  { %v2595_v9 = vpop.eup %2594  ;;  %v1538_v55 = vmul.f32 %v2593_v2, %v2591_v39 }
 0x509   :  { %v2597_v50 = vpop.eup %2596  ;;  %1589 = vperm.xlu0 %2308, %v1535_v56  }
 0x50a   :  { %v2599_v37 = vpop.eup %2598  ;;  %v1541_v33 = vmul.f32 %v2597_v50, %v2595_v9 }
 0x50b   :  { %1604 = vperm.xlu1 %2309, %v1538_v55   ;;  %v2601_v3 = vpop.eup %2600 }
 0x50c   :  { %v1534_v12 = vmul.f32 %v2601_v3, %v2599_v37  ;;  %v2603_v5 = vpop.eup %2602 }
 0x50d   :  { %1619 = vperm.xlu0 %2308, %v1541_v33   ;;  %v2605_v14 = vpop.eup %2604 }
 0x50e   :  { %v1540_v40 = vmul.f32 %v2605_v14, %v2603_v5 }
 0x50f   :  { %1584 = vperm.xlu1 %2309, %v1534_v12  }
 0x513   :  { %1614 = vperm.xlu1 %2309, %v1540_v40  }
 0x546   :  { %v1545_v1 = vpop.permute.xlu0 %1544 }
 0x547   :  { %v1622_v16 = vmul.f32 %v3159_v26, %v1545_v1  ;;  %v1623_v25 = vmul.f32 %v3161_v10, %v1545_v1  ;;  %v3514_v1 = vld [vmem:[#allocation10_spill] sm:$0xff] }
 0x54a   :  { %v1550_v41 = vpop.permute.xlu1 %1549 }
 0x54b   :  { %v1624_v62 = vmul.f32 %v3167_v35, %v1550_v41  ;;  %v1625_v44 = vmul.f32 %v3171_v51, %v1550_v41 }
 0x54d   :  { %v1654_v48 = vpack.c.bf16 %v1624_v62, %v1622_v16  ;;  %v1655_v50 = vpack.c.bf16 %v1625_v44, %v1623_v25  ;;  %v3515_v16 = vld [vmem:[#allocation8_spill] sm:$0xff]  ;;  %v3516_v62 = vld [vmem:[#allocation9_spill] sm:$0xff] }
 0x54e   :  { %v1555_v39 = vpop.permute.xlu1 %1554 }
 0x54f   :  { %1798 = vmatprep.mubr.bf16.mxu0 %v1655_v50  ;;  %v1626_v3 = vmul.f32 %v3175_v57, %v1555_v39  ;;  %v1627_v26 = vmul.f32 %v3177_v61, %v1555_v39 }
 0x550   :  { %1799 = vmatmul.mubr.bf16.vlgmr.msra.gmra.mrb[64].mxu0 %v1654_v48 }
 0x551   :  { %1937 = vmatpush1.bf16.xpose.msra.mxu0 %v3330_v17 }
 0x552   :  { %v1560_v33 = vpop.permute.xlu1 %1559  ;;  %1938 = vmatprep.subr.bf16.mxu0 %v3350_v53 }
 0x553   :  { %v1628_v10 = vmul.f32 %v3181_v36, %v1560_v33  ;;  %v1629_v35 = vmul.f32 %v3183_v4, %v1560_v33 }
 0x555   :  { %v1656_v2 = vpack.c.bf16 %v1628_v10, %v1626_v3  ;;  %v1657_v51 = vpack.c.bf16 %v1629_v35, %v1627_v26 }
 0x556   :  { %v1565_v56 = vpop.permute.xlu1 %1564 }
 0x557   :  { %1806 = vmatprep.mubr.bf16.mxu0 %v1657_v51  ;;  %v1630_v17 = vmul.f32 %v3187_v21, %v1565_v56  ;;  %v1631_v57 = vmul.f32 %v3189_v18, %v1565_v56 }
 0x558   :  { %1807 = vmatmul.mubr.bf16.gmra.mrb[68].mxu0 %v1656_v2 }
 0x559   :  { %1939 = vmatpush1.bf16.xpose.msra.mxu0 %v3345_v45 }
 0x55a   :  { %v1570_v9 = vpop.permute.xlu1 %1569  ;;  %1940 = vmatprep.subr.bf16.mxu0 %v3363_v24 }
 0x55b   :  { %v1632_v61 = vmul.f32 %v3191_v11, %v1570_v9  ;;  %v1633_v36 = vmul.f32 %v3195_v19, %v1570_v9 }
 0x55d   :  { %v1658_v53 = vpack.c.bf16 %v1632_v61, %v1630_v17  ;;  %v1659_v4 = vpack.c.bf16 %v1633_v36, %v1631_v57 }
 0x55f   :  { %1814 = vmatprep.mubr.bf16.mxu0 %v1659_v4 }
 0x560   :  { %1815 = vmatmul.mubr.bf16.gmra.mrb[72].mxu0 %v1658_v53 }
 0x561   :  { %1941 = vmatpush1.bf16.xpose.msra.mxu0 %v3358_v23 }
 0x562   :  { %1942 = vmatprep.subr.bf16.mxu0 %v3377_v8 }
 0x569   :  { %1943 = vmatpush1.bf16.xpose.msra.mxu0 %v3372_v28 }
 0x56a   :  { %1944 = vmatprep.subr.bf16.mxu0 %v3384_v0 }
 0x571   :  { %1945 = vmatpush1.bf16.xpose.msra.mxu0 %v3393_v6 }
 0x572   :  { %1946 = vmatprep.subr.bf16.mxu0 %v3399_v27 }
 0x574   :  { %v1580_v18 = vpop.permute.xlu0 %1579 }
 0x575   :  { %v1636_v27 = vmul.f32 %v3221_v20, %v1580_v18 }
 0x579   :  { %1947 = vmatpush1.bf16.xpose.msra.mxu0 %v3408_v38  ;;  %v1637_v38 = vmul.f32 %v3226_v54, %v1580_v18 }
 0x57a   :  { %1948 = vmatprep.subr.bf16.mxu0 %v3415_v13 }
 0x57e   :  { %v1595_v21 = vpop.permute.xlu1 %1594 }
 0x57f   :  { %v1642_v19 = vmul.f32 %v3231_v42, %v1595_v21  ;;  %v1643_v45 = vmul.f32 %v3233_v59, %v1595_v21 }
 0x581   :  { %1949 = vmatpush1.bf16.xpose.msra.mxu0 %v3420_v49 }
 0x582   :  { %v1600_v11 = vpop.permute.xlu1 %1599  ;;  %1950 = vmatprep.subr.bf16.mxu0 %v3432_v31 }
 0x583   :  { %v1644_v23 = vmul.f32 %v3245_v43, %v1600_v11  ;;  %v1645_v24 = vmul.f32 %v3249_v63, %v1600_v11 }
 0x584   :  { %v1610_v28 = vpop.permute.xlu0 %1609 }
 0x585   :  { %v1664_v8 = vpack.c.bf16 %v1644_v23, %v1642_v19  ;;  %v1665_v0 = vpack.c.bf16 %v1645_v24, %v1643_v45  ;;  %v1648_v31 = vmul.f32 %v3257_v58, %v1610_v28  ;;  %v1649_v55 = vmul.f32 %v3261_v47, %v1610_v28 }
 0x586   :  { %v1575_v6 = vpop.permute.xlu1 %1574 }
 0x587   :  { %v1634_v13 = vmul.f32 %v3215_v34, %v1575_v6  ;;  %v1635_v49 = vmul.f32 %v3218_v22, %v1575_v6  ;;  %1976 = vmatprep.mubr.bf16.mxu1 %v1665_v0 }
 0x588   :  { %1977 = vmatmul.mubr.bf16.vlgmr.msra.gmra.mrb[64].mxu1 %v1664_v8  ;;  %v1590_v43 = vpop.permute.xlu0 %1589 }
 0x589   :  { %v1660_v42 = vpack.c.bf16 %v1636_v27, %v1634_v13  ;;  %v1661_v59 = vpack.c.bf16 %v1637_v38, %v1635_v49  ;;  %1951 = vmatpush1.bf16.xpose.msra.mxu0 %v3427_v7  ;;  %v1640_v12 = vmul.f32 %v3239_v30, %v1590_v43  ;;  %v1641_v5 = vmul.f32 %v3243_v60, %v1590_v43 }
 0x58a   :  { %v1605_v63 = vpop.permute.xlu1 %1604 }
 0x58b   :  { %v1646_v20 = vmul.f32 %v3251_v32, %v1605_v63  ;;  %v1647_v54 = vmul.f32 %v3255_v46, %v1605_v63  ;;  %1822 = vmatprep.mubr.bf16.mxu0 %v1661_v59 }
 0x58c   :  { %1823 = vmatmul.mubr.bf16.gmra.mrb[76].mxu0 %v1660_v42  ;;  %v1620_v58 = vpop.permute.xlu0 %1619 }
 0x58d   :  { %v1666_v34 = vpack.c.bf16 %v1648_v31, %v1646_v20  ;;  %v1667_v22 = vpack.c.bf16 %v1649_v55, %v1647_v54  ;;  %v1652_v46 = vmul.f32 %v3269_v52, %v1620_v58  ;;  %v1653_v41 = vmul.f32 %v3514_v1, %v1620_v58 }
 0x58e   :  { %v1585_v37 = vpop.permute.xlu1 %1584 }
 0x58f   :  { %v1638_v7 = vmul.f32 %v3235_v29, %v1585_v37  ;;  %v1639_v14 = vmul.f32 %v3237_v15, %v1585_v37  ;;  %1984 = vmatprep.mubr.bf16.mxu1 %v1667_v22 }
 0x590   :  { %1985 = vmatmul.mubr.bf16.gmra.mrb[68].mxu1 %v1666_v34 }
 0x591   :  { %v1662_v47 = vpack.c.bf16 %v1640_v12, %v1638_v7  ;;  %v1663_v32 = vpack.c.bf16 %v1641_v5, %v1639_v14 }
 0x592   :  { %v1615_v40 = vpop.permute.xlu1 %1614 }
 0x593   :  { %v1650_v25 = vmul.f32 %v3515_v16, %v1615_v40  ;;  %v1651_v30 = vmul.f32 %v3516_v62, %v1615_v40  ;;  %1968 = vmatprep.mubr.bf16.mxu0 %v1663_v32 }
 0x594   :  { %1969 = vmatmul.mubr.bf16.vlgmr.msra.gmra.mrb[80].mxu0 %v1662_v47 }
 0x595   :  { %v1668_v60 = vpack.c.bf16 %v1652_v46, %v1650_v25  ;;  %v1669_v29 = vpack.c.bf16 %v1653_v41, %v1651_v30 }
 0x597   :  { %1992 = vmatprep.mubr.bf16.mxu1 %v1669_v29 }
 0x598   :  { %1993 = vmatmul.mubr.bf16.gmra.mrb[72].mxu1 %v1668_v60 }
 0x623   :  { %v1800_v15 = vpop.f32.mrb[64].mxu0 }
 0x624   :  { %1831 = vst [vmem:[#allocation5] sm:$0xff] %v1800_v15  ;;  %v1802_v44 = vpop.f32.mrb[65].mxu0 }
 0x625   :  { %v1803_v48 = vpop.f32.mrb[66].mxu0 }
 0x626   :  { %1832 = vst [vmem:[#allocation5 + $0x8] sm:$0xff] %v1803_v48  ;;  %v1805_v50 = vpop.f32.mrb[67].mxu0 }
 0x62b   :  { %v1808_v39 = vpop.f32.mrb[68].mxu0 }
 0x62c   :  { %1833 = vst [vmem:[#allocation5 + $0x10] sm:$0xff] %v1808_v39  ;;  %v1810_v52 = vpop.f32.mrb[69].mxu0 }
 0x62d   :  { %v1811_v33 = vpop.f32.mrb[70].mxu0 }
 0x62e   :  { %1834 = vst [vmem:[#allocation5 + $0x18] sm:$0xff] %v1811_v33  ;;  %v1813_v3 = vpop.f32.mrb[71].mxu0 }
 0x633   :  { %v1816_v26 = vpop.f32.mrb[72].mxu0 }
 0x634   :  { %1835 = vst [vmem:[#allocation5 + $0x20] sm:$0xff] %v1816_v26  ;;  %v1818_v10 = vpop.f32.mrb[73].mxu0 }
 0x635   :  { %v1819_v35 = vpop.f32.mrb[74].mxu0 }
 0x636   :  { %1836 = vst [vmem:[#allocation5 + $0x28] sm:$0xff] %v1819_v35  ;;  %v1821_v2 = vpop.f32.mrb[75].mxu0 }
 0x65b   :  { %v1978_v51 = vpop.f32.mrb[64].mxu1 }
 0x65c   :  { %2004 = vst [vmem:[#allocation5 + $0x50] sm:$0xff] %v1978_v51  ;;  %v1980_v56 = vpop.f32.mrb[65].mxu1 }
 0x65d   :  { %v1981_v9 = vpop.f32.mrb[66].mxu1 }
 0x65e   :  { %2005 = vst [vmem:[#allocation5 + $0x58] sm:$0xff] %v1981_v9  ;;  %v1983_v17 = vpop.f32.mrb[67].mxu1 }
 0x65f   :  { %v1824_v57 = vpop.f32.mrb[76].mxu0 }
 0x660   :  { %1837 = vst [vmem:[#allocation5 + $0x30] sm:$0xff] %v1824_v57  ;;  %v1826_v61 = vpop.f32.mrb[77].mxu0 }
 0x661   :  { %v1827_v36 = vpop.f32.mrb[78].mxu0 }
 0x662   :  { %1838 = vst [vmem:[#allocation5 + $0x38] sm:$0xff] %v1827_v36  ;;  %v1829_v53 = vpop.f32.mrb[79].mxu0 }
 0x663   :  { %v1986_v4 = vpop.f32.mrb[68].mxu1 }
 0x664   :  { %2006 = vst [vmem:[#allocation5 + $0x60] sm:$0xff] %v1986_v4  ;;  %v1988_v21 = vpop.f32.mrb[69].mxu1 }
 0x665   :  { %v1989_v18 = vpop.f32.mrb[70].mxu1 }
 0x666   :  { %2007 = vst [vmem:[#allocation5 + $0x68] sm:$0xff] %v1989_v18  ;;  %v1991_v11 = vpop.f32.mrb[71].mxu1 }
 0x667   :  { %v1970_v19 = vpop.f32.mrb[80].mxu0 }
 0x668   :  { %2002 = vst [vmem:[#allocation5 + $0x40] sm:$0xff] %v1970_v19  ;;  %v1972_v45 = vpop.f32.mrb[81].mxu0 }
 0x669   :  { %v1973_v23 = vpop.f32.mrb[82].mxu0 }
 0x66a   :  { %2003 = vst [vmem:[#allocation5 + $0x48] sm:$0xff] %v1973_v23  ;;  %v1975_v24 = vpop.f32.mrb[83].mxu0 }
 0x66b   :  { %v1994_v28 = vpop.f32.mrb[72].mxu1 }
 0x66c   :  { %2008 = vst [vmem:[#allocation5 + $0x70] sm:$0xff] %v1994_v28  ;;  %v1996_v8 = vpop.f32.mrb[73].mxu1 }
 0x66d   :  { %v1997_v0 = vpop.f32.mrb[74].mxu1 }
 0x66e   :  { %2009 = vst [vmem:[#allocation5 + $0x78] sm:$0xff] %v1997_v0  ;;  %v1999_v6 = vpop.f32.mrb[75].mxu1 }
 0x66f   :  { %2639 = shalt.err (!%p2636_p12)
}
 0x670   :  { %s2640_s3 = scalar_lea.hbm %s3507_s9, 2048 }
 0x671   :  { %p2641_p13 = scmp.ne.s32.totalorder %s3507_s9, %s2640_s3  ;;  %p2644_p0 = scmp.lt.u32.totalorder %s2640_s3, %s3507_s9 }
 0x673   :  { %p2646_p1 = pnand %p2644_p0, %p2641_p13 }
 0x675   :  { %2649 = shalt.err (!%p2646_p1)
}
 0x676   :  { %2021 = dma.vmem_to_hbm [thread:$0]  %s2016_s26, 2048, %s3507_s9, [#allocation4], %s2655_s19, %s2655_s19, %s2656_s20  }
 0x677   :  { %2652 = dma.done.wait [#allocation4], 2048  }
 0x678   :  { %2653 = vsyncadd [#allocation4], 4294965248 }
 0x679   :  { %2025 = vsyncpa [#allocation3], 1 }
 0x67a   :  { %2026 = vsyncpa [#allocation4], 1 }

</bundles_post_ra>
